<compile_context>
chip_gen: v7x
topology: tpu7x:2x2x1
jax: 0.10.0
libtpu: 0.0.40
codegen_flags: <defaults>
</compile_context>

<pallas_src>
import jax
import jax.numpy as jnp
from jax.experimental import pallas as pl
from jax.experimental.pallas import tpu as pltpu

EPS = 1e-5


def bottleneck_kernel(x_ref, w1_ref, w2_ref, w3_ref, b1_ref, b2_ref, b3_ref,
                      o_ref, pad_ref):
    # x_ref  : (NB, H, W, Cin)                      activations (batch tile)
    # w1_ref : (Cin, Cmid)      bf16, BN1 scale folded in
    # w2_ref : (9*Cmid, Cmid)   bf16, BN2 scale folded in (im2col layout)
    # w3_ref : (Cmid, Cexp)     bf16, BN3 scale folded in
    # b*_ref : (1, C)           f32 folded BN biases
    # o_ref  : (NB, H, W*Cexp)  lane-dense output block
    # pad_ref: (NB, H+2, W+2, Cmid) bf16 zero-edged scratch for the 3x3 conv
    NB, Hp2, Wp2, Cmid = pad_ref.shape
    H, W = Hp2 - 2, Wp2 - 2
    Cin = w1_ref.shape[0]
    Cexp = w3_ref.shape[1]
    M = NB * H * W
    cdt = w1_ref.dtype                     # MXU operand dtype (bf16)

    # Residual path stays f32 so the skip connection is exact.
    x_f32 = x_ref[...].astype(jnp.float32).reshape(M, Cin)

    # ---- conv1 (1x1) [+ folded BN1] + relu : one MXU matmul ----------------
    h1 = jnp.dot(x_f32.astype(cdt), w1_ref[...],
                 preferred_element_type=jnp.float32)
    h1 = jnp.maximum(h1 + b1_ref[...], 0.0)                    # (M, Cmid) f32

    # ---- conv2 (3x3, stride=1, pad=1) [+ folded BN2] + relu ----------------
    # Stage h1 into a zero-edged scratch; the border zeros are the conv
    # padding.  Zero every step (scratch is per-core; cheap and safe).
    pad_ref[...] = jnp.zeros(pad_ref.shape, pad_ref.dtype)
    pad_ref[:, 1:H + 1, 1:W + 1, :] = h1.astype(pad_ref.dtype).reshape(
        NB, H, W, Cmid)

    # im2col: 9 static ref-slice taps stacked along K -> ONE matmul, K=9*Cmid.
    taps = []
    for ky in range(3):
        for kx in range(3):
            taps.append(pad_ref[:, ky:ky + H, kx:kx + W, :].reshape(M, Cmid))
    im2col = jnp.concatenate(taps, axis=-1)                    # (M, 9*Cmid) bf16
    h2 = jnp.dot(im2col, w2_ref[...], preferred_element_type=jnp.float32)
    h2 = jnp.maximum(h2 + b2_ref[...], 0.0)                    # (M, Cmid) f32

    # ---- conv3 (1x1) [+ folded BN3] + residual + relu ----------------------
    h3 = jnp.dot(h2.astype(cdt), w3_ref[...],
                 preferred_element_type=jnp.float32)
    out = jnp.maximum(h3 + b3_ref[...] + x_f32, 0.0)           # (M, Cexp) f32

    # Lane-dense writeback: pack the W pixels of each row into the lane dim so
    # the store is W*Cexp (>=128) lanes wide instead of masked Cexp-lane stores.
    out4 = out.reshape(NB, H, W, Cexp)
    out_dense = jnp.concatenate([out4[:, :, w, :] for w in range(W)], axis=-1)
    o_ref[...] = out_dense.astype(o_ref.dtype)                 # (NB, H, W*Cexp)


def _pick_batch_tile(n, h, w, target_rows=128):
    """Largest divisor of n giving >= target_rows matmul rows per grid step,
    while keeping several parallel grid steps when n is large (v7x: 2 TCs)."""
    nb = 1
    for d in range(1, n + 1):
        if n % d == 0:
            nb = d
            if d * h * w >= target_rows:
                break
    return nb


def bottleneck_pallas(x_nhwc, w1, w2, w3, b1, b2, b3, *, batch_tile=None):
    """x_nhwc: (N,H,W,Cin).  w1:(Cin,Cmid) w2:(9*Cmid,Cmid) w3:(Cmid,Cexp)
    (BN scales already folded, bf16).  b*: (1,C) f32 folded BN biases."""
    N, H, W, Cin = x_nhwc.shape
    Cmid = w1.shape[1]
    Cexp = w3.shape[1]
    assert Cexp == Cin, "stride=1/downsample=None requires Cin == planes*expansion"
    assert w2.shape == (9 * Cmid, Cmid)

    NB = batch_tile if batch_tile is not None else _pick_batch_tile(N, H, W)
    assert N % NB == 0
    grid = (N // NB,)

    def full_spec(a):
        r = a.ndim
        return pl.BlockSpec(a.shape, lambda n, _r=r: (0,) * _r)

    # VMEM budget hint: double-buffered IO blocks + params + scratch + slack.
    io_bytes = x_nhwc.dtype.itemsize
    x_blk = NB * H * W * Cin * io_bytes
    o_blk = NB * H * W * Cexp * io_bytes
    p_bytes = sum(int(a.size) * a.dtype.itemsize for a in (w1, w2, w3, b1, b2, b3))
    scratch_bytes = NB * (H + 2) * (W + 2) * max(Cmid, 128) * 2
    vmem_limit = int(max(4 * (2 * (x_blk + o_blk) + 2 * p_bytes + scratch_bytes)
                         + (8 << 20), 16 << 20))

    out = pl.pallas_call(
        bottleneck_kernel,
        out_shape=jax.ShapeDtypeStruct((N, H, W * Cexp), x_nhwc.dtype),
        grid=grid,
        in_specs=[
            pl.BlockSpec((NB, H, W, Cin), lambda n: (n, 0, 0, 0)),
            full_spec(w1), full_spec(w2), full_spec(w3),
            full_spec(b1), full_spec(b2), full_spec(b3),
        ],
        out_specs=pl.BlockSpec((NB, H, W * Cexp), lambda n: (n, 0, 0)),
        scratch_shapes=[pltpu.VMEM((NB, H + 2, W + 2, Cmid), w1.dtype)],
        compiler_params=pltpu.CompilerParams(
            dimension_semantics=("parallel",),
            vmem_limit_bytes=vmem_limit),
    )(x_nhwc, w1, w2, w3, b1, b2, b3)
    return out.reshape(N, H, W, Cexp)


def fold_bn(gamma, beta, mean, var):
    s = gamma / jnp.sqrt(var + EPS)
    b = beta - mean * s
    return s[None, :], b[None, :]


def prepare_params(w1_t, w2_t, w3_t, bn1, bn2, bn3, compute_dtype=jnp.bfloat16):
    """PyTorch OIHW conv weights -> kernel layout, BN scale folded in (bf16
    MXU operands); folded BN biases stay f32."""
    s1, b1 = fold_bn(*bn1)
    s2, b2 = fold_bn(*bn2)
    s3, b3 = fold_bn(*bn3)
    w1 = jnp.transpose(w1_t[:, :, 0, 0], (1, 0)) * s1                   # [Cin,Cmid]
    w2 = jnp.transpose(w2_t, (2, 3, 1, 0)).reshape(
        9 * w2_t.shape[1], w2_t.shape[0]) * s2                          # [9*Cmid,Cmid]
    w3 = jnp.transpose(w3_t[:, :, 0, 0], (1, 0)) * s3                   # [Cmid,Cexp]
    return (w1.astype(compute_dtype), w2.astype(compute_dtype),
            w3.astype(compute_dtype),
            b1.astype(jnp.float32), b2.astype(jnp.float32), b3.astype(jnp.float32))


def reference_forward(x_nchw, w1_t, w2_t, w3_t, bn1, bn2, bn3,
                      op_dtype=jnp.float32, fold_scale=False):
    """Plain-JAX reference.  Defaults == PyTorch eval-mode forward in f32.
    op_dtype=bf16 + fold_scale=True mirrors the kernel's bf16-operand math
    (f32 accumulation) exactly up to accumulation order."""
    def conv(x, w, pad):
        return jax.lax.conv_general_dilated(
            x.astype(op_dtype), w.astype(op_dtype), (1, 1),
            [(pad, pad), (pad, pad)],
            dimension_numbers=("NCHW", "OIHW", "NCHW"),
            preferred_element_type=jnp.float32)

    def block(x, w, pad, p):
        g, be, m, v = p
        s = g / jnp.sqrt(v + EPS)
        b = be - m * s
        if fold_scale:
            return conv(x, w * s[:, None, None, None], pad) + b[None, :, None, None]
        return conv(x, w, pad) * s[None, :, None, None] + b[None, :, None, None]

    out = jax.nn.relu(block(x_nchw, w1_t, 0, bn1))
    out = jax.nn.relu(block(out, w2_t, 1, bn2))
    out = block(out, w3_t, 0, bn3)
    return jax.nn.relu(out + x_nchw)


if __name__ == "__main__":
    # Small shapes consistent with the module: downsample=None requires
    # inplanes == planes * expansion.
    N, H, W = 2, 8, 8
    planes = 8
    expansion = 4
    inplanes = planes * expansion          # 32
    Cexp = planes * expansion              # 32

    keys = jax.random.split(jax.random.PRNGKey(0), 16)
    x_nchw = jax.random.normal(keys[0], (N, inplanes, H, W), jnp.float32)

    # Conv weights in PyTorch OIHW layout (bias=False).
    w1_t = 0.1 * jax.random.normal(keys[1], (planes, inplanes, 1, 1), jnp.float32)
    w2_t = 0.1 * jax.random.normal(keys[2], (planes, planes, 3, 3), jnp.float32)
    w3_t = 0.1 * jax.random.normal(keys[3], (Cexp, planes, 1, 1), jnp.float32)

    def bn_params(k0, k1, k2, k3, c):
        gamma = 1.0 + 0.1 * jax.random.normal(k0, (c,), jnp.float32)
        beta = 0.1 * jax.random.normal(k1, (c,), jnp.float32)
        mean = 0.1 * jax.random.normal(k2, (c,), jnp.float32)
        var = 1.0 + 0.1 * jax.random.uniform(k3, (c,), jnp.float32)
        return gamma, beta, mean, var

    bn1 = bn_params(keys[4], keys[5], keys[6], keys[7], planes)
    bn2 = bn_params(keys[8], keys[9], keys[10], keys[11], planes)
    bn3 = bn_params(keys[12], keys[13], keys[14], keys[15], Cexp)

    # Kernel-side parameters (BN folded, bf16 MXU operands).
    w1_k, w2_k, w3_k, b1, b2, b3 = prepare_params(w1_t, w2_t, w3_t, bn1, bn2, bn3)

    x_nhwc = jnp.transpose(x_nchw, (0, 2, 3, 1))                 # [N,H,W,Cin]
    out_nhwc = bottleneck_pallas(x_nhwc, w1_k, w2_k, w3_k, b1, b2, b3)
    out_nhwc = jax.block_until_ready(out_nhwc)
    out_nchw = jnp.transpose(out_nhwc, (0, 3, 1, 2))

    # Exact-math check: same bf16-operand / f32-accumulation recipe as kernel.
    ref_matched = reference_forward(x_nchw, w1_t, w2_t, w3_t, bn1, bn2, bn3,
                                    op_dtype=jnp.bfloat16, fold_scale=True)
    # Semantics check against the full-f32 PyTorch-equivalent forward.
    ref_f32 = reference_forward(x_nchw, w1_t, w2_t, w3_t, bn1, bn2, bn3)

    assert out_nchw.shape == ref_f32.shape == (N, Cexp, H, W)
    err_matched = float(jnp.max(jnp.abs(out_nchw - ref_matched)))
    err_f32 = float(jnp.max(jnp.abs(out_nchw - ref_f32)))
    assert err_matched < 2e-3, ("mismatch vs bf16-matched reference", err_matched)
    assert err_f32 < 5e-2, ("mismatch vs f32 reference", err_f32)

    print("KERNEL_OK")
</pallas_src>

<mosaic_0001>
module attributes {stable_mosaic.version = 11 : i64} {
  func.func @bottleneck_kernel(%arg0: i32, %arg1: memref<2x8x8x32xf32, #tpu.memory_space<vmem>>, %arg2: memref<32x8xbf16, #tpu.memory_space<vmem>>, %arg3: memref<72x8xbf16, #tpu.memory_space<vmem>>, %arg4: memref<8x32xbf16, #tpu.memory_space<vmem>>, %arg5: memref<1x8xf32, #tpu.memory_space<vmem>>, %arg6: memref<1x8xf32, #tpu.memory_space<vmem>>, %arg7: memref<1x32xf32, #tpu.memory_space<vmem>>, %arg8: memref<2x8x256xf32, #tpu.memory_space<vmem>>, %arg9: memref<2x10x10x8xbf16, #tpu.memory_space<vmem>>) attributes {dimension_semantics = [#tpu.dimension_semantics<parallel>], iteration_bounds = array<i64: 1>, scalar_prefetch = 0 : i64, scratch_operands = 1 : i64, tpu.core_type = #tpu.core_type<tc>, window_params = [{transform_indices = @transform_0, window_bounds = array<i64: 2, 8, 8, 32>}, {pipeline_mode = #tpu.pipeline_mode<synchronous>, transform_indices = @transform_1, window_bounds = array<i64: 32, 8>}, {pipeline_mode = #tpu.pipeline_mode<synchronous>, transform_indices = @transform_2, window_bounds = array<i64: 72, 8>}, {pipeline_mode = #tpu.pipeline_mode<synchronous>, transform_indices = @transform_3, window_bounds = array<i64: 8, 32>}, {pipeline_mode = #tpu.pipeline_mode<synchronous>, transform_indices = @transform_4, window_bounds = array<i64: 1, 8>}, {pipeline_mode = #tpu.pipeline_mode<synchronous>, transform_indices = @transform_5, window_bounds = array<i64: 1, 8>}, {pipeline_mode = #tpu.pipeline_mode<synchronous>, transform_indices = @transform_6, window_bounds = array<i64: 1, 32>}, {transform_indices = @transform_7, window_bounds = array<i64: 2, 8, 256>}]} {
    %c0 = arith.constant 0 : index
    %c0_0 = arith.constant 0 : index
    %c0_1 = arith.constant 0 : index
    %c0_2 = arith.constant 0 : index
    %0 = vector.load %arg1[%c0, %c0_0, %c0_1, %c0_2] : memref<2x8x8x32xf32, #tpu.memory_space<vmem>>, vector<2x8x8x32xf32>
    %1 = vector.shape_cast %0 : vector<2x8x8x32xf32> to vector<128x32xf32>
    %2 = arith.truncf %1 : vector<128x32xf32> to vector<128x32xbf16>
    %c0_3 = arith.constant 0 : index
    %c0_4 = arith.constant 0 : index
    %3 = vector.load %arg2[%c0_3, %c0_4] : memref<32x8xbf16, #tpu.memory_space<vmem>>, vector<32x8xbf16>
    %cst = arith.constant dense<0.000000e+00> : vector<128x8xf32>
    %4 = tpu.matmul %2, %3, %cst {dimension_numbers = #tpu.dot_dimension_numbers<[1], [0], [0], [1], [0, 0, 1, 1], [], []>} : vector<128x32xbf16>, vector<32x8xbf16>, vector<128x8xf32> -> vector<128x8xf32>
    %c0_5 = arith.constant 0 : index
    %c0_6 = arith.constant 0 : index
    %5 = vector.load %arg5[%c0_5, %c0_6] : memref<1x8xf32, #tpu.memory_space<vmem>>, vector<1x8xf32>
    %6 = vector.broadcast %5 : vector<1x8xf32> to vector<128x8xf32>
    %7 = arith.addf %4, %6 : vector<128x8xf32>
    %cst_7 = arith.constant 0.000000e+00 : f32
    %8 = vector.broadcast %cst_7 : f32 to vector<128x8xf32>
    %9 = arith.maximumf %7, %8 : vector<128x8xf32>
    %cst_8 = arith.constant 0.000000e+00 : bf16
    %10 = vector.broadcast %cst_8 : bf16 to vector<2x10x10x8xbf16>
    %c0_9 = arith.constant 0 : index
    %c0_10 = arith.constant 0 : index
    %c0_11 = arith.constant 0 : index
    %c0_12 = arith.constant 0 : index
    %11 = vector.load %arg9[%c0_9, %c0_10, %c0_11, %c0_12] : memref<2x10x10x8xbf16, #tpu.memory_space<vmem>>, vector<2x10x10x8xbf16>
    tpu.vector_store %arg9[%c0_9, %c0_10, %c0_11, %c0_12], %10 {strides = array<i32>} : memref<2x10x10x8xbf16, #tpu.memory_space<vmem>>, vector<2x10x10x8xbf16>,
    %12 = arith.truncf %9 : vector<128x8xf32> to vector<128x8xbf16>
    %13 = vector.shape_cast %12 : vector<128x8xbf16> to vector<2x8x8x8xbf16>
    %c0_13 = arith.constant 0 : index
    %c1 = arith.constant 1 : index
    %c1_14 = arith.constant 1 : index
    %c0_15 = arith.constant 0 : index
    %14 = vector.load %arg9[%c0_13, %c1, %c1_14, %c0_15] : memref<2x10x10x8xbf16, #tpu.memory_space<vmem>>, vector<2x8x8x8xbf16>
    tpu.vector_store %arg9[%c0_13, %c1, %c1_14, %c0_15], %13 {strides = array<i32>} : memref<2x10x10x8xbf16, #tpu.memory_space<vmem>>, vector<2x8x8x8xbf16>,
    %c0_16 = arith.constant 0 : index
    %c0_17 = arith.constant 0 : index
    %c0_18 = arith.constant 0 : index
    %c0_19 = arith.constant 0 : index
    %15 = vector.load %arg9[%c0_16, %c0_17, %c0_18, %c0_19] : memref<2x10x10x8xbf16, #tpu.memory_space<vmem>>, vector<2x8x8x8xbf16>
    %16 = vector.shape_cast %15 : vector<2x8x8x8xbf16> to vector<128x8xbf16>
    %c0_20 = arith.constant 0 : index
    %c0_21 = arith.constant 0 : index
    %c1_22 = arith.constant 1 : index
    %c0_23 = arith.constant 0 : index
    %17 = vector.load %arg9[%c0_20, %c0_21, %c1_22, %c0_23] : memref<2x10x10x8xbf16, #tpu.memory_space<vmem>>, vector<2x8x8x8xbf16>
    %18 = vector.shape_cast %17 : vector<2x8x8x8xbf16> to vector<128x8xbf16>
    %c0_24 = arith.constant 0 : index
    %c0_25 = arith.constant 0 : index
    %c2 = arith.constant 2 : index
    %c0_26 = arith.constant 0 : index
    %19 = vector.load %arg9[%c0_24, %c0_25, %c2, %c0_26] : memref<2x10x10x8xbf16, #tpu.memory_space<vmem>>, vector<2x8x8x8xbf16>
    %20 = vector.shape_cast %19 : vector<2x8x8x8xbf16> to vector<128x8xbf16>
    %c0_27 = arith.constant 0 : index
    %c1_28 = arith.constant 1 : index
    %c0_29 = arith.constant 0 : index
    %c0_30 = arith.constant 0 : index
    %21 = vector.load %arg9[%c0_27, %c1_28, %c0_29, %c0_30] : memref<2x10x10x8xbf16, #tpu.memory_space<vmem>>, vector<2x8x8x8xbf16>
    %22 = vector.shape_cast %21 : vector<2x8x8x8xbf16> to vector<128x8xbf16>
    %c0_31 = arith.constant 0 : index
    %c1_32 = arith.constant 1 : index
    %c1_33 = arith.constant 1 : index
    %c0_34 = arith.constant 0 : index
    %23 = vector.load %arg9[%c0_31, %c1_32, %c1_33, %c0_34] : memref<2x10x10x8xbf16, #tpu.memory_space<vmem>>, vector<2x8x8x8xbf16>
    %24 = vector.shape_cast %23 : vector<2x8x8x8xbf16> to vector<128x8xbf16>
    %c0_35 = arith.constant 0 : index
    %c1_36 = arith.constant 1 : index
    %c2_37 = arith.constant 2 : index
    %c0_38 = arith.constant 0 : index
    %25 = vector.load %arg9[%c0_35, %c1_36, %c2_37, %c0_38] : memref<2x10x10x8xbf16, #tpu.memory_space<vmem>>, vector<2x8x8x8xbf16>
    %26 = vector.shape_cast %25 : vector<2x8x8x8xbf16> to vector<128x8xbf16>
    %c0_39 = arith.constant 0 : index
    %c2_40 = arith.constant 2 : index
    %c0_41 = arith.constant 0 : index
    %c0_42 = arith.constant 0 : index
    %27 = vector.load %arg9[%c0_39, %c2_40, %c0_41, %c0_42] : memref<2x10x10x8xbf16, #tpu.memory_space<vmem>>, vector<2x8x8x8xbf16>
    %28 = vector.shape_cast %27 : vector<2x8x8x8xbf16> to vector<128x8xbf16>
    %c0_43 = arith.constant 0 : index
    %c2_44 = arith.constant 2 : index
    %c1_45 = arith.constant 1 : index
    %c0_46 = arith.constant 0 : index
    %29 = vector.load %arg9[%c0_43, %c2_44, %c1_45, %c0_46] : memref<2x10x10x8xbf16, #tpu.memory_space<vmem>>, vector<2x8x8x8xbf16>
    %30 = vector.shape_cast %29 : vector<2x8x8x8xbf16> to vector<128x8xbf16>
    %c0_47 = arith.constant 0 : index
    %c2_48 = arith.constant 2 : index
    %c2_49 = arith.constant 2 : index
    %c0_50 = arith.constant 0 : index
    %31 = vector.load %arg9[%c0_47, %c2_48, %c2_49, %c0_50] : memref<2x10x10x8xbf16, #tpu.memory_space<vmem>>, vector<2x8x8x8xbf16>
    %32 = vector.shape_cast %31 : vector<2x8x8x8xbf16> to vector<128x8xbf16>
    %33 = tpu.concatenate %16, %18, %20, %22, %24, %26, %28, %30, %32 in 1 : vector<128x8xbf16>, vector<128x8xbf16>, vector<128x8xbf16>, vector<128x8xbf16>, vector<128x8xbf16>, vector<128x8xbf16>, vector<128x8xbf16>, vector<128x8xbf16>, vector<128x8xbf16> -> vector<128x72xbf16>
    %c0_51 = arith.constant 0 : index
    %c0_52 = arith.constant 0 : index
    %34 = vector.load %arg3[%c0_51, %c0_52] : memref<72x8xbf16, #tpu.memory_space<vmem>>, vector<72x8xbf16>
    %cst_53 = arith.constant dense<0.000000e+00> : vector<128x8xf32>
    %35 = tpu.matmul %33, %34, %cst_53 {dimension_numbers = #tpu.dot_dimension_numbers<[1], [0], [0], [1], [0, 0, 1, 1], [], []>} : vector<128x72xbf16>, vector<72x8xbf16>, vector<128x8xf32> -> vector<128x8xf32>
    %c0_54 = arith.constant 0 : index
    %c0_55 = arith.constant 0 : index
    %36 = vector.load %arg6[%c0_54, %c0_55] : memref<1x8xf32, #tpu.memory_space<vmem>>, vector<1x8xf32>
    %37 = vector.broadcast %36 : vector<1x8xf32> to vector<128x8xf32>
    %38 = arith.addf %35, %37 : vector<128x8xf32>
    %cst_56 = arith.constant 0.000000e+00 : f32
    %39 = vector.broadcast %cst_56 : f32 to vector<128x8xf32>
    %40 = arith.maximumf %38, %39 : vector<128x8xf32>
    %41 = arith.truncf %40 : vector<128x8xf32> to vector<128x8xbf16>
    %c0_57 = arith.constant 0 : index
    %c0_58 = arith.constant 0 : index
    %42 = vector.load %arg4[%c0_57, %c0_58] : memref<8x32xbf16, #tpu.memory_space<vmem>>, vector<8x32xbf16>
    %cst_59 = arith.constant dense<0.000000e+00> : vector<128x32xf32>
    %43 = tpu.matmul %41, %42, %cst_59 {dimension_numbers = #tpu.dot_dimension_numbers<[1], [0], [0], [1], [0, 0, 1, 1], [], []>} : vector<128x8xbf16>, vector<8x32xbf16>, vector<128x32xf32> -> vector<128x32xf32>
    %c0_60 = arith.constant 0 : index
    %c0_61 = arith.constant 0 : index
    %44 = vector.load %arg7[%c0_60, %c0_61] : memref<1x32xf32, #tpu.memory_space<vmem>>, vector<1x32xf32>
    %45 = vector.broadcast %44 : vector<1x32xf32> to vector<128x32xf32>
    %46 = arith.addf %43, %45 : vector<128x32xf32>
    %47 = arith.addf %46, %1 : vector<128x32xf32>
    %cst_62 = arith.constant 0.000000e+00 : f32
    %48 = vector.broadcast %cst_62 : f32 to vector<128x32xf32>
    %49 = arith.maximumf %47, %48 : vector<128x32xf32>
    %50 = vector.shape_cast %49 : vector<128x32xf32> to vector<2x8x8x32xf32>
    %51 = vector.extract_strided_slice %50 {offsets = [0, 0, 0, 0], sizes = [2, 8, 1, 32], strides = [1, 1, 1, 1]} : vector<2x8x8x32xf32> to vector<2x8x1x32xf32>
    %52 = vector.shape_cast %51 : vector<2x8x1x32xf32> to vector<2x8x32xf32>
    %53 = vector.extract_strided_slice %50 {offsets = [0, 0, 1, 0], sizes = [2, 8, 1, 32], strides = [1, 1, 1, 1]} : vector<2x8x8x32xf32> to vector<2x8x1x32xf32>
    %54 = vector.shape_cast %53 : vector<2x8x1x32xf32> to vector<2x8x32xf32>
    %55 = vector.extract_strided_slice %50 {offsets = [0, 0, 2, 0], sizes = [2, 8, 1, 32], strides = [1, 1, 1, 1]} : vector<2x8x8x32xf32> to vector<2x8x1x32xf32>
    %56 = vector.shape_cast %55 : vector<2x8x1x32xf32> to vector<2x8x32xf32>
    %57 = vector.extract_strided_slice %50 {offsets = [0, 0, 3, 0], sizes = [2, 8, 1, 32], strides = [1, 1, 1, 1]} : vector<2x8x8x32xf32> to vector<2x8x1x32xf32>
    %58 = vector.shape_cast %57 : vector<2x8x1x32xf32> to vector<2x8x32xf32>
    %59 = vector.extract_strided_slice %50 {offsets = [0, 0, 4, 0], sizes = [2, 8, 1, 32], strides = [1, 1, 1, 1]} : vector<2x8x8x32xf32> to vector<2x8x1x32xf32>
    %60 = vector.shape_cast %59 : vector<2x8x1x32xf32> to vector<2x8x32xf32>
    %61 = vector.extract_strided_slice %50 {offsets = [0, 0, 5, 0], sizes = [2, 8, 1, 32], strides = [1, 1, 1, 1]} : vector<2x8x8x32xf32> to vector<2x8x1x32xf32>
    %62 = vector.shape_cast %61 : vector<2x8x1x32xf32> to vector<2x8x32xf32>
    %63 = vector.extract_strided_slice %50 {offsets = [0, 0, 6, 0], sizes = [2, 8, 1, 32], strides = [1, 1, 1, 1]} : vector<2x8x8x32xf32> to vector<2x8x1x32xf32>
    %64 = vector.shape_cast %63 : vector<2x8x1x32xf32> to vector<2x8x32xf32>
    %65 = vector.extract_strided_slice %50 {offsets = [0, 0, 7, 0], sizes = [2, 8, 1, 32], strides = [1, 1, 1, 1]} : vector<2x8x8x32xf32> to vector<2x8x1x32xf32>
    %66 = vector.shape_cast %65 : vector<2x8x1x32xf32> to vector<2x8x32xf32>
    %67 = tpu.concatenate %52, %54, %56, %58, %60, %62, %64, %66 in 2 : vector<2x8x32xf32>, vector<2x8x32xf32>, vector<2x8x32xf32>, vector<2x8x32xf32>, vector<2x8x32xf32>, vector<2x8x32xf32>, vector<2x8x32xf32>, vector<2x8x32xf32> -> vector<2x8x256xf32>
    %c0_63 = arith.constant 0 : index
    %c0_64 = arith.constant 0 : index
    %c0_65 = arith.constant 0 : index
    %68 = vector.load %arg8[%c0_63, %c0_64, %c0_65] : memref<2x8x256xf32, #tpu.memory_space<vmem>>, vector<2x8x256xf32>
    tpu.vector_store %arg8[%c0_63, %c0_64, %c0_65], %67 {strides = array<i32>} : memref<2x8x256xf32, #tpu.memory_space<vmem>>, vector<2x8x256xf32>,
    return
  }
  func.func @transform_0(%arg0: i32) -> (i32, i32, i32, i32) {
    %c0_i32 = arith.constant 0 : i32
    %c0_i32_0 = arith.constant 0 : i32
    %c0_i32_1 = arith.constant 0 : i32
    %c0_i32_2 = arith.constant 0 : i32
    return %arg0, %c0_i32, %c0_i32_0, %c0_i32_1 : i32, i32, i32, i32
  }
  func.func @transform_1(%arg0: i32) -> (i32, i32) {
    %c0_i32 = arith.constant 0 : i32
    %c0_i32_0 = arith.constant 0 : i32
    %c0_i32_1 = arith.constant 0 : i32
    return %c0_i32, %c0_i32_0 : i32, i32
  }
  func.func @transform_2(%arg0: i32) -> (i32, i32) {
    %c0_i32 = arith.constant 0 : i32
    %c0_i32_0 = arith.constant 0 : i32
    %c0_i32_1 = arith.constant 0 : i32
    return %c0_i32, %c0_i32_0 : i32, i32
  }
  func.func @transform_3(%arg0: i32) -> (i32, i32) {
    %c0_i32 = arith.constant 0 : i32
    %c0_i32_0 = arith.constant 0 : i32
    %c0_i32_1 = arith.constant 0 : i32
    return %c0_i32, %c0_i32_0 : i32, i32
  }
  func.func @transform_4(%arg0: i32) -> (i32, i32) {
    %c0_i32 = arith.constant 0 : i32
    %c0_i32_0 = arith.constant 0 : i32
    %c0_i32_1 = arith.constant 0 : i32
    return %c0_i32, %c0_i32_0 : i32, i32
  }
  func.func @transform_5(%arg0: i32) -> (i32, i32) {
    %c0_i32 = arith.constant 0 : i32
    %c0_i32_0 = arith.constant 0 : i32
    %c0_i32_1 = arith.constant 0 : i32
    return %c0_i32, %c0_i32_0 : i32, i32
  }
  func.func @transform_6(%arg0: i32) -> (i32, i32) {
    %c0_i32 = arith.constant 0 : i32
    %c0_i32_0 = arith.constant 0 : i32
    %c0_i32_1 = arith.constant 0 : i32
    return %c0_i32, %c0_i32_0 : i32, i32
  }
  func.func @transform_7(%arg0: i32) -> (i32, i32, i32) {
    %c0_i32 = arith.constant 0 : i32
    %c0_i32_0 = arith.constant 0 : i32
    %c0_i32_1 = arith.constant 0 : i32
    return %arg0, %c0_i32, %c0_i32_0 : i32, i32, i32
  }
}

</mosaic_0001>

<bundles_post_ra>
// kernel: tpu_custom_call.1
= control target key start
LH: loop header
LB: loop body
LE: loop exit
PB: predicated region body
PF: predicated region fallthrough
CT: control target
= control target key end

     0   :  { %12 = vsyncpa [#allocation4], 0  ;;  %s4713_s0 = inlined_call_operand.hbm [shape: f32[2,8,8,32], index: 0, kind: input, shape index: {}]   ;;  %s4714_s1 = inlined_call_operand.vmem [shape: bf16[32,8], index: 1, kind: input, shape index: {}]   ;;  %s4715_s2 = inlined_call_operand.vmem [shape: bf16[72,8], index: 2, kind: input, shape index: {}]   ;;  %s4716_s3 = inlined_call_operand.vmem [shape: bf16[8,32], index: 3, kind: input, shape index: {}]   ;;  %s4717_s4 = inlined_call_operand.vmem [shape: f32[1,8], index: 4, kind: input, shape index: {}]   ;;  %s4718_s5 = inlined_call_operand.vmem [shape: f32[1,8], index: 5, kind: input, shape index: {}]   ;;  %s4719_s6 = inlined_call_operand.vmem [shape: f32[1,32], index: 6, kind: input, shape index: {}]   ;;  %s4720_s7 = inlined_call_operand.hbm [shape: f32[2,8,256], index: 7, kind: output, shape index: {}]  }
   0x1   :  { %13 = vsyncpa [#allocation5], 0  ;;  %s3301_s24 = smov [#allocation3]   ;;  %s3253_s28 = scalar_lea.hbm %s4713_s0, 2048 }
   0x2   :  { %s19_s25 = sshll.u32 %s3301_s24, 4  ;;  %p3254_p0 = scmp.ne.s32.totalorder %s4713_s0, %s3253_s28  ;;  %s20_s25 = int_to_ptr.vmem [resolvable:$true] %s19_s25 }
   0x3   :  { %p3257_p1 = scmp.lt.u32.totalorder %s3253_s28, %s4713_s0 }
   0x5   :  { %p3259_p2 = pnand %p3257_p1, %p3254_p0 }
   0x7   :  { %3262 = shalt.err (!%p3259_p2)
}
   0x8   :  { %s3263_s10 = scalar_lea.vmem %s20_s25, 2048  ;;  %p3268_p4 = scmp.lt.s32.totalorder %s20_s25, %s20_s25 }
   0x9   :  { %p3264_p3 = scmp.ne.s32.totalorder %s20_s25, %s3263_s10  ;;  %p3269_p5 = scmp.lt.s32.totalorder %s3263_s10, %s3263_s10 }
   0xb   :  { %p3270_p6 = por %p3269_p5, %p3268_p4 }
   0xd   :  { %p3271_p7 = pnand %p3270_p6, %p3264_p3 }
   0xf   :  { %3274 = shalt.err (!%p3271_p7)
}
  0x10   :  { %s3302_s11 = smov 128   ;;  %s3303_s12 = smov 8  }
  0x11   :  { %25 = dma.hbm_to_vmem [thread:$0]  %s4713_s0, 2048, %s20_s25, [#allocation4], %s3302_s11, %s3302_s11, %s3303_s12  }
  0x12   :  { %3297 = dma.done.wait [#allocation4], 2048  }
  0x13   :  { %3298 = vsyncadd [#allocation4], 4294965248  ;;  %v3198_v0 = vld [vmem:[%s4714_s1] sm:$0xff]   ;;  %v3199_v1 = vld [vmem:[%s4714_s1 + $0x8] sm:$0xff]   ;;  %vm89_vm0 = vcmask 261120   ;;  %vm227_vm1 = vcmask 60416  }
  0x14   :  { %3114 = vmatprep.subr.bf16.mxu0 %v3198_v0  ;;  %3178 = vmatprep.subr.bf16.mxu1 %v3198_v0  ;;  %v42_v2 = vld [vmem:[#allocation3] sm:$0xff]  ;;  %v43_v3 = vld [vmem:[#allocation3 + $0x8] sm:$0xff]  ;;  %v44_v7 = vld [vmem:[#allocation3 + $0x10] sm:$0xff]  ;;  %vm229_vm2 = vcmask 57344   ;;  %v3304_v26 = vmov 0   ;;  %vm887_vm3 = vcmask 1042432  }
  0x15   :  { %v46_v4 = vld [vmem:[#allocation3 + $0x20] sm:$0xff]  ;;  %3115 = vmatpush3.bf16.msra.mxu0 %v3198_v0  ;;  %3180 = vmatpush3.bf16.msra.mxu1 %v3198_v0  ;;  %v58_v5 = vpack.c.bf16 %v43_v3, %v42_v2  ;;  %v47_v6 = vld [vmem:[#allocation3 + $0x28] sm:$0xff]  ;;  %v45_v8 = vld [vmem:[#allocation3 + $0x18] sm:$0xff]  ;;  %235 = vst.msk [vmem:[#allocation2 + $0x18] sm:$0xf] %vm227_vm1, %v3304_v26  ;;  %vm888_vm4 = vcmask 1046532  }
  0x16   :  { %3116 = vmatprep.subr.bf16.mxu0 %v3199_v1  ;;  %3179 = vmatprep.subr.bf16.mxu1 %v3199_v1  ;;  %v60_v9 = vpack.c.bf16 %v47_v6, %v46_v4  ;;  %v48_v10 = vld [vmem:[#allocation3 + $0x30] sm:$0xff]  ;;  %v49_v11 = vld [vmem:[#allocation3 + $0x38] sm:$0xff]  ;;  %v50_v12 = vld [vmem:[#allocation3 + $0x40] sm:$0xff]  ;;  %v59_v14 = vpack.c.bf16 %v45_v8, %v44_v7  ;;  %236 = vst.msk [vmem:[#allocation2 + $0x1c] sm:$0x1] %vm229_vm2, %v3304_v26  ;;  %s3306_s19 = smov 48  }
  0x17   :  { %3118 = vmatprep.mubr.msk.bf16.mxu0 %vm89_vm0, %v58_v5  ;;  %v51_v13 = vld [vmem:[#allocation3 + $0x48] sm:$0xff]  ;;  %v61_v15 = vpack.c.bf16 %v49_v11, %v48_v10  ;;  %v52_v17 = vld [vmem:[#allocation3 + $0x50] sm:$0xff]  ;;  %v53_v18 = vld [vmem:[#allocation3 + $0x58] sm:$0xff]  ;;  %228 = vst.msk [vmem:[#allocation2] sm:$0xf] %vm227_vm1, %v3304_v26  ;;  %s3307_s20 = smov 16  }
  0x18   :  { %3122 = vmatprep.mubr.msk.bf16.mxu1 %vm89_vm0, %v60_v9  ;;  %v62_v16 = vpack.c.bf16 %v51_v13, %v50_v12  ;;  %v54_v19 = vld [vmem:[#allocation3 + $0x60] sm:$0xff]  ;;  %v55_v20 = vld [vmem:[#allocation3 + $0x68] sm:$0xff]  ;;  %v63_v21 = vpack.c.bf16 %v53_v18, %v52_v17  ;;  %v56_v23 = vld [vmem:[#allocation3 + $0x70] sm:$0xff]  ;;  %230 = vst.msk [vmem:[#allocation2 + $0x4] sm:$0x1] %vm229_vm2, %v3304_v26  ;;  %s3308_s21 = smov 64  }
  0x19   :  { %3117 = vmatpush3.bf16.msra.mxu0 %v3199_v1  ;;  %3181 = vmatpush3.bf16.msra.mxu1 %v3199_v1  ;;  %v64_v22 = vpack.c.bf16 %v55_v20, %v54_v19  ;;  %v57_v24 = vld [vmem:[#allocation3 + $0x78] sm:$0xff]  ;;  %231 = vst.msk [vmem:[#allocation2 + $0x8] sm:$0xf] %vm227_vm1, %v3304_v26  ;;  %233 = vst.msk [vmem:[#allocation2 + $0x10] sm:$0xf] %vm227_vm1, %v3304_v26  ;;  %s3309_s22 = smov 40  }
  0x1a   :  { %v65_v25 = vpack.c.bf16 %v57_v24, %v56_v23  ;;  %232 = vst.msk [vmem:[#allocation2 + $0xc] sm:$0x1] %vm229_vm2, %v3304_v26  ;;  %234 = vst.msk [vmem:[#allocation2 + $0x14] sm:$0x1] %vm229_vm2, %v3304_v26  ;;  %vm612_vm5 = vsmask.f32 3328 }
  0x1b   :  { %237 = vst.msk [vmem:[#allocation2 + $0x20] sm:$0xf] %vm227_vm1, %v3304_v26  ;;  %239 = vst.msk [vmem:[#allocation2 + $0x28] sm:$0xf] %vm227_vm1, %v3304_v26  ;;  %vm613_vm6 = vsmask.f32 7440 }
  0x1c   :  { %3119 = vmatmul.mubr.msk.bf16.vlgmr.msra.gmra.mrb[0].mxu0 %vm89_vm0, %v59_v14  ;;  %3123 = vmatmul.mubr.msk.bf16.vlgmr.msra.gmra.mrb[0].mxu1 %vm89_vm0, %v61_v15  ;;  %238 = vst.msk [vmem:[#allocation2 + $0x24] sm:$0x1] %vm229_vm2, %v3304_v26  ;;  %240 = vst.msk [vmem:[#allocation2 + $0x2c] sm:$0x1] %vm229_vm2, %v3304_v26  ;;  %v3429_v49 = vld [vmem:[%s4717_s4] ss:$0 sm:$0xff] }
  0x1d   :  { %3126 = vmatprep.mubr.msk.bf16.mxu1 %vm89_vm0, %v62_v16  ;;  %241 = vst.msk [vmem:[#allocation2 + $0x30] sm:$0xf] %vm227_vm1, %v3304_v26  ;;  %243 = vst.msk [vmem:[#allocation2 + $0x38] sm:$0xf] %vm227_vm1, %v3304_v26  ;;  %vm479_vm9 = vsmask.f32 7938 }
  0x1e   :  { %242 = vst.msk [vmem:[#allocation2 + $0x34] sm:$0x1] %vm229_vm2, %v3304_v26  ;;  %244 = vst.msk [vmem:[#allocation2 + $0x3c] sm:$0x1] %vm229_vm2, %v3304_v26  ;;  %v580_v28 = vld [vmem:[#allocation2] sm:$0xf] }
  0x1f   :  { %245 = vst.msk [vmem:[#allocation2 + $0x40] sm:$0xf] %vm227_vm1, %v3304_v26  ;;  %247 = vst.msk [vmem:[#allocation2 + $0x48] sm:$0xf] %vm227_vm1, %v3304_v26  ;;  %v616_v31 = vshrl.u32 %v580_v28, 16  ;;  %v619_v32 = vshll.u32 %v580_v28, 16 }
  0x20   :  { %246 = vst.msk [vmem:[#allocation2 + $0x44] sm:$0x1] %vm229_vm2, %v3304_v26  ;;  %248 = vst.msk [vmem:[#allocation2 + $0x4c] sm:$0x1] %vm229_vm2, %v3304_v26  ;;  %v596_v37 = vld [vmem:[#allocation2 + $0x4] sm:$0x1] }
  0x21   :  { %249 = vst.msk [vmem:[#allocation2 + $0x50] sm:$0xf] %vm227_vm1, %v3304_v26  ;;  %251 = vst.msk [vmem:[#allocation2 + $0x58] sm:$0xf] %vm227_vm1, %v3304_v26  ;;  %v618_v35 = vrot.slane %v616_v31, 4  ;;  %v621_v36 = vrot.slane %v619_v32, 5 }
  0x22   :  { %250 = vst.msk [vmem:[#allocation2 + $0x54] sm:$0x1] %vm229_vm2, %v3304_v26  ;;  %252 = vst.msk [vmem:[#allocation2 + $0x5c] sm:$0x1] %vm229_vm2, %v3304_v26  ;;  %v839_v39 = vld [vmem:[#allocation2] sm:$0xe] }
  0x23   :  { %253 = vst.msk [vmem:[#allocation2 + $0x60] sm:$0xf] %vm227_vm1, %v3304_v26  ;;  %255 = vst.msk [vmem:[#allocation2 + $0x68] sm:$0xf] %vm227_vm1, %v3304_v26  ;;  %v622_v41 = vor.u32 %v621_v36, %v618_v35  ;;  %v625_v42 = vshll.u32 %v596_v37, 16  ;;  %v2923_v45 = vrot.slane %v839_v39, 9 }
  0x24   :  { %3127 = vmatmul.mubr.msk.bf16.gmra.mrb[4].mxu1 %vm89_vm0, %v63_v21  ;;  %254 = vst.msk [vmem:[#allocation2 + $0x64] sm:$0x1] %vm229_vm2, %v3304_v26  ;;  %256 = vst.msk [vmem:[#allocation2 + $0x6c] sm:$0x1] %vm229_vm2, %v3304_v26  ;;  %v892_v46 = vrot.slane %v596_v37, 5  ;;  %s3305_s4 = smov 24  }
  0x25   :  { %3130 = vmatprep.mubr.msk.bf16.mxu1 %vm89_vm0, %v64_v22  ;;  %257 = vst.msk [vmem:[#allocation2 + $0x70] sm:$0xf] %vm227_vm1, %v3304_v26  ;;  %259 = vst.msk [vmem:[#allocation2 + $0x78] sm:$0xf] %vm227_vm1, %v3304_v26  ;;  %v3435_v51 = vrot.slane %v622_v41, 4  ;;  %v3437_v52 = vrot.slane %v625_v42, 5 }
  0x26   :  { %258 = vst.msk [vmem:[#allocation2 + $0x74] sm:$0x1] %vm229_vm2, %v3304_v26  ;;  %260 = vst.msk [vmem:[#allocation2 + $0x7c] sm:$0x1] %vm229_vm2, %v3304_v26  ;;  %v3422_v27 = vld [vmem:[#allocation2 + $0x48] sm:$0xf] }
  0x27   :  { %261 = vst.msk [vmem:[#allocation2 + $0x80] sm:$0xf] %vm227_vm1, %v3304_v26  ;;  %263 = vst.msk [vmem:[#allocation2 + $0x88] sm:$0xf] %vm227_vm1, %v3304_v26  ;;  %v1454_v29 = vshrl.u32 %v3422_v27, 16  ;;  %v1457_v30 = vshll.u32 %v3422_v27, 16 }
  0x28   :  { %262 = vst.msk [vmem:[#allocation2 + $0x84] sm:$0x1] %vm229_vm2, %v3304_v26  ;;  %264 = vst.msk [vmem:[#allocation2 + $0x8c] sm:$0x1] %vm229_vm2, %v3304_v26  ;;  %v1346_v38 = vld [vmem:[#allocation2 + $0x4c] sm:$0x1] }
  0x29   :  { %265 = vst.msk [vmem:[#allocation2 + $0x90] sm:$0xf] %vm227_vm1, %v3304_v26  ;;  %267 = vst.msk [vmem:[#allocation2 + $0x98] sm:$0xf] %vm227_vm1, %v3304_v26  ;;  %v1456_v33 = vrot.slane %v1454_v29, 4  ;;  %v1459_v34 = vrot.slane %v1457_v30, 5 }
  0x2a   :  { %266 = vst.msk [vmem:[#allocation2 + $0x94] sm:$0x1] %vm229_vm2, %v3304_v26  ;;  %268 = vst.msk [vmem:[#allocation2 + $0x9c] sm:$0x1] %vm229_vm2, %v3304_v26  ;;  %v1586_v40 = vld [vmem:[#allocation2 + $0x48] sm:$0xe] }
  0x2b   :  { %v1460_v43 = vor.u32 %v1459_v34, %v1456_v33  ;;  %v1463_v44 = vshll.u32 %v1346_v38, 16  ;;  %v2962_v47 = vrot.slane %v1586_v40, 9  ;;  %v1657_v48 = vrot.slane %v1346_v38, 5  ;;  %vm3431_vm7 = vmor %vm887_vm3, %vm888_vm4  ;;  %v496_v29 = vld [vmem:[#allocation2 + $0x18] sm:$0xf]  ;;  %s3310_s23 = smov 32  }
  0x2c   :  { %3131 = vmatmul.mubr.msk.bf16.gmra.mrb[8].mxu1 %vm89_vm0, %v65_v25  ;;  %vm3443_vm8 = vmor %vm612_vm5, %vm613_vm6  ;;  %vm485_vm10 = vsmask.f32 256  ;;  %v3451_v62 = vsel %vm3431_vm7, %v2923_v45, %v892_v46  ;;  %v499_v30 = vld [vmem:[#allocation2 + $0x1c] sm:$0x1]  ;;  %v520_v31 = vld [vmem:[#allocation2 + $0x38] sm:$0xf] }
  0x2d   :  { %v3439_v53 = vrot.slane %v1460_v43, 4  ;;  %v3441_v54 = vrot.slane %v1463_v44, 5  ;;  %v3455_v63 = vsel %vm3431_vm7, %v2962_v47, %v1657_v48  ;;  %vm3473_vm11 = vmand %vm227_vm1, %vm479_vm9  ;;  %v523_v40 = vld [vmem:[#allocation2 + $0x3c] sm:$0x1]  ;;  %v481_v41 = vld [vmem:[#allocation2 + $0x8] sm:$0xf] }
  0x2e   :  { %v487_v42 = vld [vmem:[#allocation2 + $0xc] sm:$0x1]  ;;  %vm3483_vm12 = vmand %vm229_vm2, %vm485_vm10  ;;  %s3311_s24 = smov 56   ;;  %vm2286_vm13 = vcmask 1043456   ;;  %vm2083_vm14 = vcmask 64512   ;;  %vm2108_vm15 = vcmask 130048  }
  0x2f   :  { %vm2125_vm1 = vcmask 195584   ;;  %vm2158_vm2 = vcmask 326656   ;;  %vm2175_vm3 = vcmask 392192   ;;  %vm2192_vm4 = vcmask 457728   ;;  %s3313_s15 = smov [#allocation6]  }
  0x30   :  { %vm2209_vm5 = vcmask 523264   ;;  %vm2269_vm6 = vcmask 588800   ;;  %vm2598_vm9 = vcmask 1043459   ;;  %vm2604_vm10 = vcmask 1045509   ;;  %s2884_s16 = sshll.u32 %s3313_s15, 4  ;;  %s2885_s16 = int_to_ptr.vmem [resolvable:$true] %s2884_s16 }
  0x31   :  { %s3275_s17 = scalar_lea.vmem %s2885_s16, 512  ;;  %p3280_p9 = scmp.lt.s32.totalorder %s2885_s16, %s2885_s16 }
  0x32   :  { %p3276_p8 = scmp.ne.s32.totalorder %s2885_s16, %s3275_s17  ;;  %p3281_p10 = scmp.lt.s32.totalorder %s3275_s17, %s3275_s17 }
  0x34   :  { %p3282_p11 = por %p3281_p10, %p3280_p9 }
  0x36   :  { %p3283_p12 = pnand %p3282_p11, %p3276_p8 }
  0xef   :  { %v3120_v56 = vpop.f32.mrb[0].mxu0  ;;  %v3124_v57 = vpop.f32.mrb[0].mxu1 }
  0xf0   :  { %v157_v58 = vadd.f32 %v3120_v56, %v3429_v49  ;;  %v173_v59 = vadd.f32 %v3124_v57, %v3429_v49  ;;  %v148_v60 = vpop.f32.mrb[1].mxu0  ;;  %v164_v61 = vpop.f32.mrb[1].mxu1  ;;  %v508_v56 = vld [vmem:[#allocation2 + $0x28] sm:$0xf] }
  0xf1   :  { %v149_v0 = vadd.f32 %v3429_v49, %v148_v60  ;;  %v165_v1 = vadd.f32 %v3429_v49, %v164_v61  ;;  %v3121_v2 = vpop.f32.mrb[2].mxu0  ;;  %v3125_v3 = vpop.f32.mrb[2].mxu1 }
  0xf2   :  { %v213_v6 = vmax.f32 %v157_v58, 0.0  ;;  %v217_v7 = vmax.f32 %v173_v59, 0.0  ;;  %v160_v8 = vadd.f32 %v3121_v2, %v3429_v49  ;;  %v176_v9 = vadd.f32 %v3125_v3, %v3429_v49  ;;  %v151_v10 = vpop.f32.mrb[3].mxu0  ;;  %v167_v11 = vpop.f32.mrb[3].mxu1  ;;  %v511_v2 = vld [vmem:[#allocation2 + $0x2c] sm:$0x1] }
  0xf3   :  { %v211_v12 = vmax.f32 %v149_v0, 0.0  ;;  %v215_v13 = vmax.f32 %v165_v1, 0.0  ;;  %v152_v14 = vadd.f32 %v3429_v49, %v151_v10  ;;  %v168_v15 = vadd.f32 %v3429_v49, %v167_v11 }
  0xf4   :  { %v3068_v16 = vpack.c.bf16 %v213_v6, %v213_v6  ;;  %v3072_v17 = vpack.c.bf16 %v217_v7, %v217_v7  ;;  %v214_v18 = vmax.f32 %v160_v8, 0.0  ;;  %v218_v19 = vmax.f32 %v176_v9, 0.0 }
  0xf5   :  { %v3066_v20 = vpack.c.bf16 %v211_v12, %v211_v12  ;;  %v3070_v21 = vpack.c.bf16 %v215_v13, %v215_v13  ;;  %v212_v22 = vmax.f32 %v152_v14, 0.0  ;;  %v216_v23 = vmax.f32 %v168_v15, 0.0 }
  0xf6   :  { %v334_v24 = vshrl.u32 %v3068_v16, 16  ;;  %v337_v25 = vshll.u32 %v3068_v16, 16  ;;  %v366_v26 = vshrl.u32 %v3072_v17, 16  ;;  %v369_v28 = vshll.u32 %v3072_v17, 16 }
  0xf7   :  { %v318_v32 = vshrl.u32 %v3066_v20, 16  ;;  %v321_v33 = vshll.u32 %v3066_v20, 16  ;;  %v350_v34 = vshrl.u32 %v3070_v21, 16  ;;  %v353_v35 = vshll.u32 %v3070_v21, 16  ;;  %v3128_v36 = vpop.f32.mrb[4].mxu1 }
  0xf8   :  { %v336_v37 = vrot.slane %v334_v24, 7  ;;  %v368_v39 = vrot.slane %v366_v26, 7  ;;  %v3477_v43 = vpack.c.bf16 %v214_v18, %v214_v18  ;;  %v3479_v44 = vpack.c.bf16 %v218_v19, %v218_v19  ;;  %v180_v45 = vpop.f32.mrb[5].mxu1  ;;  %v526_v24 = vld [vmem:[#allocation2 + $0x40] sm:$0xf] }
  0xf9   :  { %v320_v47 = vrot.slane %v318_v32, 7  ;;  %v352_v48 = vrot.slane %v350_v34, 7  ;;  %v3067_v57 = vpack.c.bf16 %v212_v22, %v212_v22  ;;  %v3487_v58 = vpack.c.bf16 %v216_v23, %v216_v23  ;;  %v3129_v59 = vpop.f32.mrb[6].mxu1  ;;  %v502_v22 = vld [vmem:[#allocation2 + $0x20] sm:$0xf] }
  0xfa   :  { %v339_v60 = vor.u32 %v337_v25, %v336_v37  ;;  %v340_v61 = vrot.slane %v336_v37, 4  ;;  %v371_v0 = vor.u32 %v369_v28, %v368_v39  ;;  %v372_v1 = vrot.slane %v368_v39, 4  ;;  %v183_v3 = vpop.f32.mrb[7].mxu1  ;;  %v505_v23 = vld [vmem:[#allocation2 + $0x24] sm:$0x1] }
  0xfb   :  { %v323_v6 = vor.u32 %v321_v33, %v320_v47  ;;  %v324_v7 = vrot.slane %v320_v47, 4  ;;  %v355_v8 = vor.u32 %v353_v35, %v352_v48  ;;  %v356_v9 = vrot.slane %v352_v48, 4  ;;  %v529_v33 = vld [vmem:[#allocation2 + $0x44] sm:$0x1]  ;;  %v490_v34 = vld [vmem:[#allocation2 + $0x10] sm:$0xf] }
  0xfc   :  { %v497_v10 = vsel %vm3473_vm11, %v339_v60, %v496_v29  ;;  %v500_v11 = vsel %vm3483_vm12, %v340_v61, %v499_v30  ;;  %v521_v12 = vsel %vm3473_vm11, %v371_v0, %v520_v31  ;;  %v524_v13 = vsel %vm3483_vm12, %v372_v1, %v523_v40  ;;  %v493_v35 = vld [vmem:[#allocation2 + $0x14] sm:$0x1] }
  0xfd   :  { %498 = vst [vmem:[#allocation2 + $0x18] sm:$0xf] %v497_v10  ;;  %501 = vst [vmem:[#allocation2 + $0x1c] sm:$0x1] %v500_v11  ;;  %v482_v14 = vsel %vm3473_vm11, %v323_v6, %v481_v41  ;;  %v488_v15 = vsel %vm3483_vm12, %v324_v7, %v487_v42  ;;  %v509_v16 = vsel %vm3473_vm11, %v355_v8, %v508_v56  ;;  %v342_v18 = vshrl.u32 %v3477_v43, 16 }
  0xfe   :  { %522 = vst [vmem:[#allocation2 + $0x38] sm:$0xf] %v521_v12  ;;  %525 = vst [vmem:[#allocation2 + $0x3c] sm:$0x1] %v524_v13  ;;  %v512_v17 = vsel %vm3483_vm12, %v356_v9, %v511_v2  ;;  %v345_v19 = vshll.u32 %v3477_v43, 16  ;;  %v374_v20 = vshrl.u32 %v3479_v44, 16  ;;  %v189_v37 = vadd.f32 %v3128_v36, %v3429_v49 }
  0xff   :  { %483 = vst [vmem:[#allocation2 + $0x8] sm:$0xf] %v482_v14  ;;  %489 = vst [vmem:[#allocation2 + $0xc] sm:$0x1] %v488_v15  ;;  %v377_v21 = vshll.u32 %v3479_v44, 16  ;;  %v326_v25 = vshrl.u32 %v3067_v57, 16  ;;  %v181_v39 = vadd.f32 %v3429_v49, %v180_v45  ;;  %v3518_v44 = vadd.f32 %v3129_v59, %v3429_v49 }
 0x100   :  { %510 = vst [vmem:[#allocation2 + $0x28] sm:$0xf] %v509_v16  ;;  %513 = vst [vmem:[#allocation2 + $0x2c] sm:$0x1] %v512_v17  ;;  %v329_v26 = vshll.u32 %v3067_v57, 16  ;;  %v358_v28 = vshrl.u32 %v3487_v58, 16  ;;  %v3521_v47 = vadd.f32 %v3429_v49, %v183_v3 }
 0x101   :  { %v361_v29 = vshll.u32 %v3487_v58, 16  ;;  %v3511_v30 = vpop.f32.mrb[8].mxu1  ;;  %v344_v31 = vrot.slane %v342_v18, 7  ;;  %v376_v32 = vrot.slane %v374_v20, 7  ;;  %v328_v41 = vrot.slane %v326_v25, 7 }
 0x102   :  { %v3515_v40 = vpop.f32.mrb[9].mxu1  ;;  %v360_v42 = vrot.slane %v358_v28, 7  ;;  %v514_v43 = vld [vmem:[#allocation2 + $0x30] sm:$0xf]  ;;  %v517_v36 = vld [vmem:[#allocation2 + $0x34] sm:$0x1] }
 0x103   :  { %v3523_v48 = vpop.f32.mrb[10].mxu1  ;;  %v347_v56 = vor.u32 %v345_v19, %v344_v31  ;;  %v348_v57 = vrot.slane %v344_v31, 4  ;;  %v379_v58 = vor.u32 %v377_v21, %v376_v32  ;;  %v380_v60 = vrot.slane %v376_v32, 4 }
 0x104   :  { %v3525_v61 = vpop.f32.mrb[11].mxu1  ;;  %v331_v45 = vor.u32 %v329_v26, %v328_v41  ;;  %v332_v0 = vrot.slane %v328_v41, 4  ;;  %v363_v1 = vor.u32 %v361_v29, %v360_v42  ;;  %v364_v2 = vrot.slane %v360_v42, 4  ;;  %v956_v8 = vld [vmem:[#allocation2 + $0x18] sm:$0xf] }
 0x105   :  { %v503_v59 = vsel %vm3473_vm11, %v347_v56, %v502_v22  ;;  %v506_v3 = vsel %vm3483_vm12, %v348_v57, %v505_v23  ;;  %v527_v6 = vsel %vm3473_vm11, %v379_v58, %v526_v24  ;;  %v530_v7 = vsel %vm3483_vm12, %v380_v60, %v529_v33  ;;  %v3547_v23 = vld [vmem:[#allocation2 + $0x18] sm:$0xf] }
 0x106   :  { %504 = vst [vmem:[#allocation2 + $0x20] sm:$0xf] %v503_v59  ;;  %507 = vst [vmem:[#allocation2 + $0x24] sm:$0x1] %v506_v3  ;;  %v491_v9 = vsel %vm3473_vm11, %v331_v45, %v490_v34  ;;  %v494_v10 = vsel %vm3483_vm12, %v332_v0, %v493_v35  ;;  %v515_v11 = vsel %vm3473_vm11, %v363_v1, %v514_v43  ;;  %v954_v13 = vld [vmem:[#allocation2 + $0x8] sm:$0xf] }
 0x107   :  { %528 = vst [vmem:[#allocation2 + $0x40] sm:$0xf] %v527_v6  ;;  %531 = vst [vmem:[#allocation2 + $0x44] sm:$0x1] %v530_v7  ;;  %v518_v12 = vsel %vm3483_vm12, %v364_v2, %v517_v36  ;;  %v3543_v14 = vld [vmem:[#allocation2 + $0x28] sm:$0xf]  ;;  %v3561_v1 = vadd.f32 %v3511_v30, %v3429_v49 }
 0x108   :  { %492 = vst [vmem:[#allocation2 + $0x10] sm:$0xf] %v491_v9  ;;  %495 = vst [vmem:[#allocation2 + $0x14] sm:$0x1] %v494_v10  ;;  %v1015_v15 = vshrl.u32 %v956_v8, 16  ;;  %v1018_v16 = vshll.u32 %v956_v8, 16 }
 0x109   :  { %516 = vst [vmem:[#allocation2 + $0x30] sm:$0xf] %v515_v11  ;;  %519 = vst [vmem:[#allocation2 + $0x34] sm:$0x1] %v518_v12  ;;  %v987_v17 = vshrl.u32 %v954_v13, 16  ;;  %v990_v18 = vshll.u32 %v954_v13, 16 }
 0x10a   :  { %v221_v19 = vmax.f32 %v189_v37, 0.0  ;;  %v219_v20 = vmax.f32 %v181_v39, 0.0  ;;  %v1398_v21 = vshrl.u32 %v3543_v14, 16  ;;  %v1401_v22 = vshll.u32 %v3543_v14, 16  ;;  %v544_v36 = vld [vmem:[#allocation2 + $0x68] sm:$0xf] }
 0x10b   :  { %v1017_v24 = vrot.slane %v1015_v15, 4  ;;  %v1020_v25 = vrot.slane %v1018_v16, 5  ;;  %v989_v26 = vrot.slane %v987_v17, 4  ;;  %v992_v28 = vrot.slane %v990_v18, 5  ;;  %v547_v45 = vld [vmem:[#allocation2 + $0x6c] sm:$0x1] }
 0x10c   :  { %v3076_v29 = vpack.c.bf16 %v221_v19, %v221_v19  ;;  %v3074_v31 = vpack.c.bf16 %v219_v20, %v219_v20  ;;  %v3549_v32 = vrot.slane %v1398_v21, 4  ;;  %v3551_v33 = vrot.slane %v1401_v22, 5  ;;  %v532_v7 = vld [vmem:[#allocation2 + $0x58] sm:$0xf]  ;;  %v535_v30 = vld [vmem:[#allocation2 + $0x5c] sm:$0x1] }
 0x10d   :  { %v1021_v34 = vor.u32 %v1020_v25, %v1017_v24  ;;  %v993_v35 = vor.u32 %v992_v28, %v989_v26  ;;  %v222_v37 = vmax.f32 %v3518_v44, 0.0  ;;  %v1370_v39 = vshrl.u32 %v3547_v23, 16  ;;  %v957_v57 = vld [vmem:[#allocation2 + $0x20] sm:$0xf]  ;;  %v3659_v4 = vld [vmem:[#allocation2 + $0x24] sm:$0x1] }
 0x10e   :  { %v398_v41 = vshrl.u32 %v3076_v29, 16  ;;  %v401_v42 = vshll.u32 %v3076_v29, 16  ;;  %v382_v43 = vshrl.u32 %v3074_v31, 16  ;;  %v385_v56 = vshll.u32 %v3074_v31, 16  ;;  %v1325_v15 = vld [vmem:[#allocation2 + $0x20] sm:$0xf] }
 0x10f   :  { %v3555_v58 = vrot.slane %v1021_v34, 4  ;;  %v3557_v60 = vrot.slane %v993_v35, 4  ;;  %v3077_v0 = vpack.c.bf16 %v222_v37, %v222_v37  ;;  %v2996_v2 = vcombine.low %v956_v8, %v957_v57  ;;  %v955_v3 = vld [vmem:[#allocation2 + $0x10] sm:$0xf] }
 0x110   :  { %v1029_v44 = vshrl.u32 %v957_v57, 16  ;;  %v1032_v59 = vshll.u32 %v957_v57, 16  ;;  %v400_v6 = vrot.slane %v398_v41, 7  ;;  %v1001_v9 = vshrl.u32 %v955_v3, 16  ;;  %v1323_v28 = vld [vmem:[#allocation2 + $0x10] sm:$0xf] }
 0x111   :  { %4733 = vst [vmem:[#allocation9_spill] sm:$0xff] %v3557_v60  ;;  %v1004_v10 = vshll.u32 %v955_v3, 16  ;;  %v2995_v11 = vcombine.low %v954_v13, %v955_v3  ;;  %v384_v12 = vrot.slane %v382_v43, 7  ;;  %1853 = vrot.lane.b32.xlu1 %v2996_v2, %s3305_s4  ;;  %v1384_v26 = vshrl.u32 %v1325_v15, 16  ;;  %v553_v2 = vld [vmem:[#allocation2 + $0x74] sm:$0x1] }
 0x112   :  { %v1031_v16 = vrot.slane %v1029_v44, 4  ;;  %v1034_v17 = vrot.slane %v1032_v59, 5  ;;  %v403_v18 = vor.u32 %v401_v42, %v400_v6  ;;  %v404_v19 = vrot.slane %v400_v6, 4  ;;  %v3750_v60 = vld [vmem:[#allocation2 + $0x34] sm:$0x1] }
 0x113   :  { %v1003_v20 = vrot.slane %v1001_v9, 4  ;;  %v1006_v8 = vrot.slane %v1004_v10, 5  ;;  %1851 = vrot.lane.b32.xlu0 %v2995_v11, %s3305_s4  ;;  %v387_v21 = vor.u32 %v385_v56, %v384_v12  ;;  %v388_v22 = vrot.slane %v384_v12, 4  ;;  %v960_v9 = vld [vmem:[#allocation2 + $0x38] sm:$0xf] }
 0x114   :  { %v1035_v24 = vor.u32 %v1034_v17, %v1031_v16  ;;  %v545_v13 = vsel %vm3473_vm11, %v403_v18, %v544_v36  ;;  %v548_v25 = vsel %vm3483_vm12, %v404_v19, %v547_v45  ;;  %v1387_v35 = vshll.u32 %v1325_v15, 16  ;;  %v550_v45 = vld [vmem:[#allocation2 + $0x70] sm:$0xf]  ;;  %v961_v12 = vld [vmem:[#allocation2 + $0x40] sm:$0xf] }
 0x115   :  { %v1007_v29 = vor.u32 %v1006_v8, %v1003_v20  ;;  %546 = vst [vmem:[#allocation2 + $0x68] sm:$0xf] %v545_v13  ;;  %549 = vst [vmem:[#allocation2 + $0x6c] sm:$0x1] %v548_v25  ;;  %v533_v31 = vsel %vm3473_vm11, %v387_v21, %v532_v7  ;;  %v536_v34 = vsel %vm3483_vm12, %v388_v22, %v535_v30  ;;  %v3575_v41 = vrot.slane %v1384_v26, 4 }
 0x116   :  { %v3573_v37 = vrot.slane %v1035_v24, 4  ;;  %534 = vst [vmem:[#allocation2 + $0x58] sm:$0xf] %v533_v31  ;;  %537 = vst [vmem:[#allocation2 + $0x5c] sm:$0x1] %v536_v34  ;;  %v3020_v42 = vcombine.low %v1325_v15, %v3543_v14  ;;  %v406_v43 = vshrl.u32 %v3077_v0, 16  ;;  %v3019_v10 = vcombine.low %v1323_v28, %v3547_v23 }
 0x117   :  { %v3578_v56 = vrot.slane %v1007_v29, 4  ;;  %v3580_v57 = vrot.slane %v1387_v35, 5  ;;  %v409_v36 = vshll.u32 %v3077_v0, 16  ;;  %v1356_v44 = vshrl.u32 %v1323_v28, 16  ;;  %v3602_v21 = vld [vmem:[#allocation2 + $0x28] sm:$0xf] }
 0x118   :  { %1989 = vrot.lane.b32.xlu1 %v3020_v42, %s3306_s19  ;;  %v408_v59 = vrot.slane %v406_v43, 7  ;;  %v1359_v3 = vshll.u32 %v1323_v28, 16  ;;  %v3583_v6 = vrot.slane %v1370_v39, 4  ;;  %v1373_v7 = vshll.u32 %v3547_v23, 16  ;;  %1987 = vrot.lane.b32.xlu0 %v3019_v10, %s3306_s19  ;;  %v959_v26 = vld [vmem:[#allocation2 + $0x30] sm:$0xf] }
 0x119   :  { %4734 = vst [vmem:[#allocation10_spill] sm:$0xff] %v3578_v56  ;;  %v3586_v14 = vrot.slane %v1356_v44, 4  ;;  %v220_v11 = vmax.f32 %v3521_v47, 0.0  ;;  %v225_v0 = vmax.f32 %v3561_v1, 0.0  ;;  %v197_v30 = vadd.f32 %v3429_v49, %v3515_v40  ;;  %v538_v28 = vld [vmem:[#allocation2 + $0x60] sm:$0xf] }
 0x11a   :  { %4735 = vst [vmem:[#allocation11_spill] sm:$0xff] %v3583_v6  ;;  %v411_v15 = vor.u32 %v409_v36, %v408_v59  ;;  %v412_v16 = vrot.slane %v408_v59, 4  ;;  %v3591_v17 = vrot.slane %v1359_v3, 5  ;;  %v3593_v18 = vrot.slane %v1373_v7, 5  ;;  %v541_v40 = vld [vmem:[#allocation2 + $0x64] sm:$0x1] }
 0x11b   :  { %4736 = vst [vmem:[#allocation12_spill] sm:$0xff] %v3586_v14  ;;  %v3075_v39 = vpack.c.bf16 %v220_v11, %v220_v11  ;;  %v3080_v19 = vpack.c.bf16 %v225_v0, %v225_v0  ;;  %v1071_v20 = vshrl.u32 %v960_v9, 16  ;;  %v1074_v1 = vshll.u32 %v960_v9, 16  ;;  %v568_v36 = vld [vmem:[#allocation2 + $0x88] sm:$0xf] }
 0x11c   :  { %4737 = vst [vmem:[#allocation13_spill] sm:$0xff] %v3591_v17  ;;  %4738 = vst [vmem:[#allocation14_spill] sm:$0xff] %v3593_v18  ;;  %v551_v47 = vsel %vm3473_vm11, %v411_v15, %v550_v45  ;;  %v554_v23 = vsel %vm3483_vm12, %v412_v16, %v553_v2  ;;  %v1085_v8 = vshrl.u32 %v961_v12, 16  ;;  %v223_v29 = vmax.f32 %v197_v30, 0.0  ;;  %v571_v44 = vld [vmem:[#allocation2 + $0x8c] sm:$0x1] }
 0x11d   :  { %552 = vst [vmem:[#allocation2 + $0x70] sm:$0xf] %v551_v47  ;;  %555 = vst [vmem:[#allocation2 + $0x74] sm:$0x1] %v554_v23  ;;  %v390_v22 = vshrl.u32 %v3075_v39, 16  ;;  %v393_v24 = vshll.u32 %v3075_v39, 16  ;;  %v2998_v2 = vcombine.low %v960_v9, %v961_v12 }
 0x11e   :  { %v430_v13 = vshrl.u32 %v3080_v19, 16  ;;  %v433_v25 = vshll.u32 %v3080_v19, 16  ;;  %v3604_v31 = vrot.slane %v1071_v20, 4  ;;  %v3606_v34 = vrot.slane %v1074_v1, 5  ;;  %v1329_v9 = vld [vmem:[#allocation2 + $0x40] sm:$0xf] }
 0x11f   :  { %v3608_v35 = vrot.slane %v1085_v8, 4  ;;  %v392_v42 = vrot.slane %v390_v22, 7  ;;  %v1088_v45 = vshll.u32 %v961_v12, 16  ;;  %v3078_v59 = vpack.c.bf16 %v223_v29, %v223_v29  ;;  %1857 = vrot.lane.b32.xlu1 %v2998_v2, %s3305_s4  ;;  %v556_v8 = vld [vmem:[#allocation2 + $0x78] sm:$0xf] }
 0x120   :  { %v432_v43 = vrot.slane %v430_v13, 7  ;;  %v1043_v3 = vshrl.u32 %v3602_v21, 16  ;;  %v1046_v7 = vshll.u32 %v3602_v21, 16  ;;  %v1057_v10 = vshrl.u32 %v959_v26, 16  ;;  %v559_v22 = vld [vmem:[#allocation2 + $0x7c] sm:$0x1] }
 0x121   :  { %v395_v11 = vor.u32 %v393_v24, %v392_v42  ;;  %v396_v0 = vrot.slane %v392_v42, 4  ;;  %v414_v39 = vshrl.u32 %v3078_v59, 16  ;;  %v417_v19 = vshll.u32 %v3078_v59, 16  ;;  %v1327_v24 = vld [vmem:[#allocation2 + $0x30] sm:$0xf] }
 0x122   :  { %v435_v15 = vor.u32 %v433_v25, %v432_v43  ;;  %v436_v16 = vrot.slane %v432_v43, 4  ;;  %v3613_v30 = vrot.slane %v1088_v45, 5  ;;  %v3615_v20 = vrot.slane %v1043_v3, 4  ;;  %v3631_v2 = vld [vmem:[#allocation2 + $0xc] sm:$0x1] }
 0x123   :  { %v539_v12 = vsel %vm3473_vm11, %v395_v11, %v538_v28  ;;  %v542_v47 = vsel %vm3483_vm12, %v396_v0, %v541_v40  ;;  %v416_v13 = vrot.slane %v414_v39, 7  ;;  %v3625_v25 = vrot.slane %v1046_v7, 5  ;;  %v1328_v40 = vld [vmem:[#allocation2 + $0x38] sm:$0xf]  ;;  %v3633_v59 = vld [vmem:[#allocation2 + $0x24] sm:$0x1] }
 0x124   :  { %4739 = vst [vmem:[#allocation15_spill] sm:$0xff] %v3615_v20  ;;  %v569_v23 = vsel %vm3473_vm11, %v435_v15, %v568_v36  ;;  %v572_v1 = vsel %vm3483_vm12, %v436_v16, %v571_v44  ;;  %540 = vst [vmem:[#allocation2 + $0x60] sm:$0xf] %v539_v12  ;;  %v3627_v28 = vrot.slane %v1057_v10, 4  ;;  %v1060_v29 = vshll.u32 %v959_v26, 16 }
 0x125   :  { %543 = vst [vmem:[#allocation2 + $0x64] sm:$0x1] %v542_v47  ;;  %570 = vst [vmem:[#allocation2 + $0x88] sm:$0xf] %v569_v23  ;;  %v2997_v42 = vcombine.low %v3602_v21, %v959_v26  ;;  %v1440_v43 = vshrl.u32 %v1329_v9, 16  ;;  %v1443_v36 = vshll.u32 %v1329_v9, 16  ;;  %v3022_v45 = vcombine.low %v1329_v9, %v3422_v27 }
 0x126   :  { %573 = vst [vmem:[#allocation2 + $0x8c] sm:$0x1] %v572_v1  ;;  %4740 = vst [vmem:[#allocation16_spill] sm:$0xff] %v3625_v25  ;;  %v840_v44 = vld [vmem:[#allocation2 + $0x8] sm:$0xe]  ;;  %v419_v3 = vor.u32 %v417_v19, %v416_v13  ;;  %v420_v11 = vrot.slane %v416_v13, 4 }
 0x127   :  { %4741 = vst [vmem:[#allocation17_spill] sm:$0xff] %v3627_v28  ;;  %v3635_v0 = vrot.slane %v1060_v29, 5  ;;  %v1412_v7 = vshrl.u32 %v1327_v24, 16  ;;  %v3637_v10 = vld [vmem:[#allocation2 + $0x2c] sm:$0x1]  ;;  %1855 = vrot.lane.b32.xlu0 %v2997_v42, %s3305_s4  ;;  %v3642_v27 = vrot.slane %v1440_v43, 4  ;;  %1993 = vrot.lane.b32.xlu1 %v3022_v45, %s3306_s19  ;;  %v3021_v45 = vcombine.low %v1327_v24, %v1328_v40 }
 0x128   :  { %v1581_v15 = vld [vmem:[#allocation2 + $0x20] sm:$0xe]  ;;  %v1582_v16 = vld [vmem:[#allocation2 + $0x28] sm:$0xe]  ;;  %v3639_v39 = vld [vmem:[#allocation2 + $0x1c] sm:$0x1]  ;;  %v557_v47 = vsel %vm3473_vm11, %v419_v3, %v556_v8  ;;  %v560_v23 = vsel %vm3483_vm12, %v420_v11, %v559_v22 }
 0x129   :  { %4742 = vst [vmem:[#allocation18_spill] sm:$0xff] %v3635_v0  ;;  %v1212_v21 = vld [vmem:[#allocation2 + $0x18] sm:$0xe]  ;;  %v3644_v26 = vrot.slane %v1443_v36, 5  ;;  %v1415_v19 = vshll.u32 %v1327_v24, 16  ;;  %v1426_v9 = vshrl.u32 %v1328_v40, 16 }
 0x12a   :  { %v3647_v12 = vld [vmem:[#allocation2 + $0x24] sm:$0x1]  ;;  %v3653_v1 = vrot.slane %v1412_v7, 4  ;;  %v1429_v13 = vshll.u32 %v1328_v40, 16  ;;  %v1213_v29 = vld [vmem:[#allocation2 + $0x20] sm:$0xe] }
 0x12b   :  { %v843_v42 = vld [vmem:[#allocation2 + $0x20] sm:$0xe]  ;;  %558 = vst [vmem:[#allocation2 + $0x78] sm:$0xf] %v557_v47  ;;  %561 = vst [vmem:[#allocation2 + $0x7c] sm:$0x1] %v560_v23  ;;  %1991 = vrot.lane.b32.xlu0 %v3021_v45, %s3306_s19 }
 0x12c   :  { %4743 = vst [vmem:[#allocation19_spill] sm:$0xff] %v3653_v1  ;;  %v3655_v43 = vrot.slane %v1415_v19, 5  ;;  %v3657_v36 = vrot.slane %v1426_v9, 4  ;;  %v2924_v5 = vrot.slane %v840_v44, 9  ;;  %v844_v0 = vld [vmem:[#allocation2 + $0x28] sm:$0xe] }
 0x12d   :  { %v3661_v8 = vrot.slane %v1429_v13, 5  ;;  %v896_v22 = vrot.slane %v3631_v2, 5  ;;  %v2957_v3 = vrot.slane %v1581_v15, 9  ;;  %v1637_v11 = vrot.slane %v3633_v59, 5  ;;  %v3665_v7 = vld [vmem:[#allocation2 + $0x2c] sm:$0x1] }
 0x12e   :  { %4744 = vst [vmem:[#allocation20_spill] sm:$0xff] %v3655_v43  ;;  %4745 = vst [vmem:[#allocation21_spill] sm:$0xff] %v3657_v36  ;;  %v3667_v47 = vld [vmem:[#allocation2 + $0x3c] sm:$0x1]  ;;  %v2958_v19 = vrot.slane %v1582_v16, 9  ;;  %v1641_v24 = vrot.slane %v3637_v10, 5 }
 0x12f   :  { %4746 = vst [vmem:[#allocation22_spill] sm:$0xff] %v3661_v8  ;;  %v2941_v40 = vrot.slane %v1212_v21, 9  ;;  %v1268_v44 = vrot.slane %v3639_v39, 5  ;;  %v3672_v9 = vld [vmem:[#allocation2 + $0x44] sm:$0x1]  ;;  %v897_v15 = vsel %vm3431_vm7, %v2924_v5, %v896_v22  ;;  %v1638_v13 = vsel %vm3431_vm7, %v2957_v3, %v1637_v11 }
 0x130   :  { %v1216_v23 = vld [vmem:[#allocation2 + $0x38] sm:$0xe]  ;;  %v2942_v8 = vrot.slane %v1213_v29, 9  ;;  %v1272_v36 = vrot.slane %v3647_v12, 5  ;;  %v1217_v43 = vld [vmem:[#allocation2 + $0x40] sm:$0xe]  ;;  %v2987_v16 = vcombine.low %v3451_v62, %v897_v15  ;;  %v1642_v21 = vsel %vm3431_vm7, %v2958_v19, %v1641_v24 }
 0x131   :  { %v3679_v45 = vld [vmem:[#allocation2 + $0x44] sm:$0x1]  ;;  %v1269_v1 = vsel %vm3431_vm7, %v2941_v40, %v1268_v44  ;;  %v2927_v28 = vrot.slane %v843_v42, 9  ;;  %v1585_v25 = vld [vmem:[#allocation2 + $0x40] sm:$0xe]  ;;  %v3036_v22 = vcombine.low %v1638_v13, %v1642_v21  ;;  %v908_v3 = vrot.slane %v3659_v4, 5 }
 0x132   :  { %v3686_v5 = vld [vmem:[#allocation2 + $0x14] sm:$0x1]  ;;  %v1273_v29 = vsel %vm3431_vm7, %v2942_v8, %v1272_v36  ;;  %v2928_v11 = vrot.slane %v844_v0, 9  ;;  %v3691_v20 = vld [vmem:[#allocation2 + $0x1c] sm:$0x1]  ;;  %1795 = vrot.lane.b32.xlu1 %v2987_v16, %s3307_s20  ;;  %v912_v42 = vrot.slane %v3665_v7, 5 }
 0x133   :  { %v841_v62 = vld [vmem:[#allocation2 + $0x10] sm:$0xe]  ;;  %v842_v15 = vld [vmem:[#allocation2 + $0x18] sm:$0xe]  ;;  %v3012_v19 = vcombine.low %v1269_v1, %v1273_v29  ;;  %v2945_v24 = vrot.slane %v1216_v23, 9  ;;  %v1284_v40 = vrot.slane %v3667_v47, 5  ;;  %2069 = vrot.lane.b32.xlu0 %v3036_v22, %s3308_s21  ;;  %v909_v0 = vsel %vm3431_vm7, %v2927_v28, %v908_v3 }
 0x134   :  { %v3696_v44 = vld [vmem:[#allocation2 + $0xc] sm:$0x1]  ;;  %v2946_v36 = vrot.slane %v1217_v43, 9  ;;  %v1288_v8 = vrot.slane %v3672_v9, 5  ;;  %v2961_v13 = vrot.slane %v1585_v25, 9  ;;  %v913_v23 = vsel %vm3431_vm7, %v2928_v11, %v912_v42 }
 0x135   :  { %4747 = vst [vmem:[#allocation23_spill] sm:$0xff] %v3696_v44  ;;  %v3702_v21 = vld [vmem:[#allocation2 + $0x14] sm:$0x1]  ;;  %v1210_v1 = vld [vmem:[#allocation2 + $0x8] sm:$0xe]  ;;  %v1285_v16 = vsel %vm3431_vm7, %v2945_v24, %v1284_v40  ;;  %v1653_v29 = vrot.slane %v3679_v45, 5  ;;  %v2989_v28 = vcombine.low %v909_v0, %v913_v23 }
 0x136   :  { %4748 = vst [vmem:[#allocation24_spill] sm:$0xff] %v3702_v21  ;;  %v2925_v18 = vrot.slane %v841_v62, 9  ;;  %v1211_v22 = vld [vmem:[#allocation2 + $0x10] sm:$0xe]  ;;  %v3709_v6 = vld [vmem:[#allocation2 + $0x34] sm:$0x1]  ;;  %v1289_v43 = vsel %vm3431_vm7, %v2946_v36, %v1288_v8  ;;  %1933 = vrot.lane.b32.xlu1 %v3012_v19, %s3309_s22 }
 0x137   :  { %v900_v25 = vrot.slane %v3686_v5, 5  ;;  %v2926_v3 = vrot.slane %v842_v15, 9  ;;  %v3714_v56 = vld [vmem:[#allocation2 + $0x3c] sm:$0x1]  ;;  %v845_v17 = vld [vmem:[#allocation2 + $0x30] sm:$0xe]  ;;  %v3014_v11 = vcombine.low %v1285_v16, %v1289_v43  ;;  %v1654_v62 = vsel %vm3431_vm7, %v2961_v13, %v1653_v29  ;;  %1799 = vrot.lane.b32.xlu0 %v2989_v28, %s3307_s20 }
 0x138   :  { %v904_v42 = vrot.slane %v3691_v20, 5  ;;  %v2939_v24 = vrot.slane %v1210_v1, 9  ;;  %v846_v40 = vld [vmem:[#allocation2 + $0x38] sm:$0xe]  ;;  %v3720_v0 = vld [vmem:[#allocation2 + $0x14] sm:$0x1]  ;;  %v3038_v15 = vcombine.low %v1654_v62, %v3455_v63 }
 0x139   :  { %4749 = vst [vmem:[#allocation25_spill] sm:$0xff] %v3720_v0  ;;  %v901_v36 = vsel %vm3431_vm7, %v2925_v18, %v900_v25  ;;  %v1260_v8 = vrot.slane %v3696_v44, 5  ;;  %v2940_v19 = vrot.slane %v1211_v22, 9  ;;  %v3727_v23 = vld [vmem:[#allocation2 + $0x1c] sm:$0x1]  ;;  %v1264_v1 = vrot.slane %v3702_v21, 5 }
 0x13a   :  { %4750 = vst [vmem:[#allocation26_spill] sm:$0xff] %v3727_v23  ;;  %v1579_v16 = vld [vmem:[#allocation2 + $0x10] sm:$0xe]  ;;  %v905_v13 = vsel %vm3431_vm7, %v2926_v3, %v904_v42  ;;  %v2929_v29 = vrot.slane %v845_v17, 9  ;;  %v916_v43 = vrot.slane %v3709_v6, 5  ;;  %v2930_v18 = vrot.slane %v846_v40, 9  ;;  %1937 = vrot.lane.b32.xlu1 %v3014_v11, %s3309_s22 }
 0x13b   :  { %v1580_v28 = vld [vmem:[#allocation2 + $0x18] sm:$0xe]  ;;  %v2988_v14 = vcombine.low %v901_v36, %v905_v13  ;;  %v1261_v63 = vsel %vm3431_vm7, %v2939_v24, %v1260_v8  ;;  %v920_v25 = vrot.slane %v3714_v56, 5  ;;  %v3736_v22 = vld [vmem:[#allocation2 + $0x68] sm:$0xf]  ;;  %v1265_v3 = vsel %vm3431_vm7, %v2940_v19, %v1264_v1  ;;  %2073 = vrot.lane.b32.xlu0 %v3038_v15, %s3308_s21 }
 0x13c   :  { %v917_v17 = vsel %vm3431_vm7, %v2929_v29, %v916_v43  ;;  %v2955_v62 = vrot.slane %v1579_v16, 9  ;;  %v1629_v42 = vrot.slane %v3720_v0, 5  ;;  %v965_v36 = vld [vmem:[#allocation2 + $0x70] sm:$0xf]  ;;  %v3744_v13 = vld [vmem:[#allocation2 + $0x2c] sm:$0x1]  ;;  %v3011_v24 = vcombine.low %v1261_v63, %v1265_v3 }
 0x13d   :  { %v921_v40 = vsel %vm3431_vm7, %v2930_v18, %v920_v25  ;;  %v2956_v8 = vrot.slane %v1580_v28, 9  ;;  %v1633_v11 = vrot.slane %v3727_v23, 5  ;;  %v1214_v19 = vld [vmem:[#allocation2 + $0x28] sm:$0xe]  ;;  %v1127_v29 = vshrl.u32 %v3736_v22, 16 }
 0x13e   :  { %v2990_v1 = vcombine.low %v917_v17, %v921_v40  ;;  %v1630_v16 = vsel %vm3431_vm7, %v2955_v62, %v1629_v42  ;;  %v1130_v43 = vshll.u32 %v3736_v22, 16  ;;  %v1215_v0 = vld [vmem:[#allocation2 + $0x30] sm:$0xe]  ;;  %v3756_v15 = vld [vmem:[#allocation2 + $0x34] sm:$0x1]  ;;  %v1141_v28 = vshrl.u32 %v965_v36, 16  ;;  %1797 = vrot.lane.b32.xlu1 %v2988_v14, %s3307_s20 }
 0x13f   :  { %v1634_v63 = vsel %vm3431_vm7, %v2956_v8, %v1633_v11  ;;  %v1144_v18 = vshll.u32 %v965_v36, 16  ;;  %v3000_v25 = vcombine.low %v3736_v22, %v965_v36  ;;  %v3761_v3 = vld [vmem:[#allocation2 + $0x3c] sm:$0x1]  ;;  %v1583_v17 = vld [vmem:[#allocation2 + $0x30] sm:$0xe]  ;;  %v3764_v42 = vrot.slane %v1127_v29, 4  ;;  %1931 = vrot.lane.b32.xlu0 %v3011_v24, %s3309_s22 }
 0x140   :  { %v3035_v62 = vcombine.low %v1630_v16, %v1634_v63  ;;  %v3766_v40 = vrot.slane %v1130_v43, 5  ;;  %v2943_v23 = vrot.slane %v1214_v19, 9  ;;  %v1584_v21 = vld [vmem:[#allocation2 + $0x38] sm:$0xe]  ;;  %v3769_v44 = vrot.slane %v1141_v28, 4 }
 0x141   :  { %v3771_v8 = vrot.slane %v1144_v18, 5  ;;  %v1276_v22 = vrot.slane %v3744_v13, 5  ;;  %v2944_v36 = vrot.slane %v1215_v0, 9  ;;  %v1280_v11 = vrot.slane %v3750_v60, 5 }
 0x142   :  { %v1024_v14 = vshll.u32 %v3639_v39, 16  ;;  %v1038_v16 = vshll.u32 %v3647_v12, 16  ;;  %v2959_v29 = vrot.slane %v1583_v17, 9  ;;  %v1645_v43 = vrot.slane %v3756_v15, 5  ;;  %1801 = vrot.lane.b32.xlu1 %v2990_v1, %s3307_s20  ;;  %v581_v17 = vld [vmem:[#allocation2 + $0x8] sm:$0xf] }
 0x143   :  { %v1277_v19 = vsel %vm3431_vm7, %v2943_v23, %v1276_v22  ;;  %v2960_v24 = vrot.slane %v1584_v21, 9  ;;  %v1649_v63 = vrot.slane %v3761_v3, 5  ;;  %v1281_v0 = vsel %vm3431_vm7, %v2944_v36, %v1280_v11  ;;  %2067 = vrot.lane.b32.xlu0 %v3035_v62, %s3308_s21 }
 0x144   :  { %v1026_v28 = vrot.slane %v1024_v14, 5  ;;  %v1040_v18 = vrot.slane %v1038_v16, 5  ;;  %v208_v39 = vadd.f32 %v3523_v48, %v3429_v49  ;;  %v3013_v12 = vcombine.low %v1277_v19, %v1281_v0 }
 0x145   :  { %v1646_v23 = vsel %vm3431_vm7, %v2959_v29, %v1645_v43  ;;  %v1650_v21 = vsel %vm3431_vm7, %v2960_v24, %v1649_v63  ;;  %v1390_v1 = vor.u32 %v3580_v57, %v3575_v41  ;;  %v1393_v16 = vshll.u32 %v3633_v59, 16  ;;  %v584_v59 = vld [vmem:[#allocation2 + $0x20] sm:$0xf] }
 0x146   :  { %v1027_v22 = vsel %vm3443_vm8, %v3555_v58, %v1026_v28  ;;  %v1041_v48 = vsel %vm3443_vm8, %v3573_v37, %v1040_v18  ;;  %v3037_v62 = vcombine.low %v1646_v23, %v1650_v21  ;;  %v226_v36 = vmax.f32 %v208_v39, 0.0  ;;  %1861 = vrot.lane.b32.xlu1 %v3000_v25, %s3305_s4 }
 0x147   :  { %v3004_v11 = vcombine.low %v1027_v22, %v1041_v48  ;;  %v1391_v14 = vrot.slane %v1390_v1, 4  ;;  %v1404_v29 = vor.u32 %v3551_v33, %v3549_v32  ;;  %v1407_v57 = vshll.u32 %v3637_v10, 16  ;;  %1935 = vrot.lane.b32.xlu0 %v3013_v12, %s3309_s22  ;;  %v577_v12 = vld [vmem:[#allocation2 + $0x94] sm:$0x1]  ;;  %v585_v22 = vld [vmem:[#allocation2 + $0x28] sm:$0xf] }
 0x148   :  { %v3081_v41 = vpack.c.bf16 %v226_v36, %v226_v36  ;;  %v200_v58 = vadd.f32 %v3429_v49, %v3525_v61  ;;  %v630_v19 = vshrl.u32 %v581_v17, 16  ;;  %v1395_v37 = vrot.slane %v1393_v16, 5  ;;  %v574_v61 = vld [vmem:[#allocation2 + $0x90] sm:$0xf] }
 0x149   :  { %v1405_v43 = vrot.slane %v1404_v29, 4  ;;  %v633_v24 = vshll.u32 %v581_v17, 16  ;;  %v639_v63 = vshll.u32 %v3631_v2, 16  ;;  %v1409_v32 = vrot.slane %v1407_v57, 5 }
 0x14a   :  { %v438_v0 = vshrl.u32 %v3081_v41, 16  ;;  %v441_v28 = vshll.u32 %v3081_v41, 16  ;;  %v224_v33 = vmax.f32 %v200_v58, 0.0  ;;  %v1396_v25 = vsel %vm3443_vm8, %v1391_v14, %v1395_v37  ;;  %1893 = vrot.lane.b32.xlu1 %v3004_v11, %s3310_s23 }
 0x14b   :  { %v632_v10 = vrot.slane %v630_v19, 4  ;;  %v635_v18 = vrot.slane %v633_v24, 5  ;;  %v641_v39 = vrot.slane %v639_v63, 5  ;;  %v1410_v2 = vsel %vm3443_vm8, %v1405_v43, %v1409_v32  ;;  %2071 = vrot.lane.b32.xlu0 %v3037_v62, %s3308_s21  ;;  %v562_v24 = vld [vmem:[#allocation2 + $0x80] sm:$0xf] }
 0x14c   :  { %v440_v49 = vrot.slane %v438_v0, 7  ;;  %v3079_v23 = vpack.c.bf16 %v224_v33, %v224_v33  ;;  %v672_v21 = vshrl.u32 %v584_v59, 16  ;;  %v3028_v1 = vcombine.low %v1396_v25, %v1410_v2  ;;  %v962_v63 = vld [vmem:[#allocation2 + $0x58] sm:$0xf]  ;;  %v963_v25 = vld [vmem:[#allocation2 + $0x60] sm:$0xf] }
 0x14d   :  { %v636_v17 = vor.u32 %v635_v18, %v632_v10  ;;  %v675_v48 = vshll.u32 %v584_v59, 16  ;;  %v681_v36 = vshll.u32 %v3659_v4, 16  ;;  %v686_v4 = vshrl.u32 %v585_v22, 16  ;;  %v565_v59 = vld [vmem:[#allocation2 + $0x84] sm:$0x1] }
 0x14e   :  { %v443_v14 = vor.u32 %v441_v28, %v440_v49  ;;  %v444_v16 = vrot.slane %v440_v49, 4  ;;  %v422_v29 = vshrl.u32 %v3079_v23, 16  ;;  %v425_v11 = vshll.u32 %v3079_v23, 16  ;;  %2029 = vrot.lane.b32.xlu1 %v3028_v1, %s3311_s24 }
 0x14f   :  { %v637_v41 = vrot.slane %v636_v17, 4  ;;  %v674_v57 = vrot.slane %v672_v21, 4  ;;  %v677_v58 = vrot.slane %v675_v48, 5  ;;  %v683_v19 = vrot.slane %v681_v36, 5 }
 0x150   :  { %v575_v37 = vsel %vm3473_vm11, %v443_v14, %v574_v61  ;;  %v578_v62 = vsel %vm3483_vm12, %v444_v16, %v577_v12  ;;  %v424_v43 = vrot.slane %v422_v29, 7  ;;  %v689_v32 = vshll.u32 %v585_v22, 16  ;;  %v1331_v14 = vld [vmem:[#allocation2 + $0x60] sm:$0xf] }
 0x151   :  { %576 = vst [vmem:[#allocation2 + $0x90] sm:$0xf] %v575_v37  ;;  %579 = vst [vmem:[#allocation2 + $0x94] sm:$0x1] %v578_v62  ;;  %v642_v0 = vsel %vm3443_vm8, %v637_v41, %v641_v39  ;;  %v678_v28 = vor.u32 %v677_v58, %v674_v57  ;;  %v695_v33 = vshll.u32 %v3665_v7, 16  ;;  %v4751_v49 = vsel %vm3443_vm8, %v3435_v51, %v3437_v52  ;;  %v3218_v37 = vld [vmem:[%s4715_s2] sm:$0xff]  }
 0x152   :  { %v427_v10 = vor.u32 %v425_v11, %v424_v43  ;;  %v428_v18 = vrot.slane %v424_v43, 4  ;;  %v2979_v61 = vcombine.low %v4751_v49, %v642_v0  ;;  %v688_v12 = vrot.slane %v686_v4, 4  ;;  %v1332_v11 = vld [vmem:[#allocation2 + $0x68] sm:$0xf]  ;;  %3134 = vmatprep.subr.bf16.mxu1 %v3218_v37  ;;  %v3220_v49 = vld [vmem:[%s4715_s2 + $0x10] sm:$0xff]  }
 0x153   :  { %v679_v2 = vrot.slane %v678_v28, 4  ;;  %v691_v23 = vrot.slane %v689_v32, 5  ;;  %v697_v21 = vrot.slane %v695_v33, 5  ;;  %v1099_v1 = vshrl.u32 %v962_v63, 16  ;;  %3135 = vmatpush3.bf16.msra.mxu1 %v3218_v37 }
 0x154   :  { %v563_v39 = vsel %vm3473_vm11, %v427_v10, %v562_v24  ;;  %v566_v7 = vsel %vm3483_vm12, %v428_v18, %v565_v59  ;;  %1755 = vrot.lane.b32.xlu0 %v2979_v61, %s3303_s12  ;;  %v1102_v17 = vshll.u32 %v962_v63, 16  ;;  %v1113_v22 = vshrl.u32 %v963_v25, 16  ;;  %v582_v59 = vld [vmem:[#allocation2 + $0x10] sm:$0xf]  ;;  %v583_v18 = vld [vmem:[#allocation2 + $0x18] sm:$0xf] }
 0x155   :  { %564 = vst [vmem:[#allocation2 + $0x80] sm:$0xf] %v563_v39  ;;  %567 = vst [vmem:[#allocation2 + $0x84] sm:$0x1] %v566_v7  ;;  %v684_v51 = vsel %vm3443_vm8, %v679_v2, %v683_v19  ;;  %v692_v52 = vor.u32 %v691_v23, %v688_v12  ;;  %v3835_v48 = vrot.slane %v1099_v1, 4  ;;  %v1116_v36 = vshll.u32 %v963_v25, 16 }
 0x156   :  { %v3837_v16 = vrot.slane %v1102_v17, 5  ;;  %v3839_v38 = vrot.slane %v1113_v22, 4  ;;  %v2999_v46 = vcombine.low %v962_v63, %v963_v25  ;;  %v1077_v29 = vor.u32 %v3606_v34, %v3604_v31  ;;  %v586_v17 = vld [vmem:[#allocation2 + $0x30] sm:$0xf] }
 0x157   :  { %v693_v41 = vrot.slane %v692_v52, 4  ;;  %v3843_v57 = vrot.slane %v1116_v36, 5  ;;  %v1080_v58 = vshll.u32 %v3667_v47, 16  ;;  %v1091_v19 = vor.u32 %v3613_v30, %v3608_v35  ;;  %v3219_v35 = vld [vmem:[%s4715_s2 + $0x8] sm:$0xff]  }
 0x158   :  { %1859 = vrot.lane.b32.xlu0 %v2999_v46, %s3305_s4  ;;  %v1078_v62 = vrot.slane %v1077_v29, 4  ;;  %v1094_v43 = vshll.u32 %v3672_v9, 16  ;;  %v1468_v24 = vshrl.u32 %v1331_v14, 16  ;;  %v1471_v31 = vshll.u32 %v1331_v14, 16  ;;  %3136 = vmatprep.subr.bf16.mxu1 %v3219_v35 }
 0x159   :  { %v698_v34 = vsel %vm3443_vm8, %v693_v41, %v697_v21  ;;  %v1082_v4 = vrot.slane %v1080_v58, 5  ;;  %v1092_v63 = vrot.slane %v1091_v19, 4  ;;  %v1482_v47 = vshrl.u32 %v1332_v11, 16  ;;  %3137 = vmatpush3.bf16.msra.mxu1 %v3219_v35 }
 0x15a   :  { %v2981_v30 = vcombine.low %v684_v51, %v698_v34  ;;  %v1096_v0 = vrot.slane %v1094_v43, 5  ;;  %v3858_v28 = vrot.slane %v1468_v24, 4  ;;  %v3860_v32 = vrot.slane %v1471_v31, 5  ;;  %3138 = vmatprep.subr.bf16.mxu1 %v3220_v49 }
 0x15b   :  { %v1083_v9 = vsel %vm3443_vm8, %v1078_v62, %v1082_v4  ;;  %v3864_v33 = vrot.slane %v1482_v47, 4  ;;  %v1485_v25 = vshll.u32 %v1332_v11, 16  ;;  %v3023_v10 = vcombine.low %v1331_v14, %v1332_v11  ;;  %v3889_v4 = vld [vmem:[#allocation2 + $0x6c] sm:$0x1] }
 0x15c   :  { %1759 = vrot.lane.b32.xlu1 %v2981_v30, %s3303_s12  ;;  %v1097_v61 = vsel %vm3443_vm8, %v1092_v63, %v1096_v0  ;;  %v1446_v12 = vor.u32 %v3644_v26, %v3642_v27  ;;  %v1449_v2 = vshll.u32 %v3679_v45, 16  ;;  %v644_v23 = vshrl.u32 %v582_v59, 16  ;;  %v587_v45 = vld [vmem:[#allocation2 + $0x38] sm:$0xf]  ;;  %v1220_v30 = vld [vmem:[#allocation2 + $0x68] sm:$0xe] }
 0x15d   :  { %v3006_v21 = vcombine.low %v1083_v9, %v1097_v61  ;;  %v3875_v1 = vrot.slane %v1485_v25, 5  ;;  %1995 = vrot.lane.b32.xlu0 %v3023_v10, %s3306_s19  ;;  %v647_v39 = vshll.u32 %v582_v59, 16  ;;  %v653_v7 = vshll.u32 %v3686_v5, 16  ;;  %3139 = vmatpush3.bf16.msra.mxu1 %v3220_v49  ;;  %v4753_v9 = vld [vmem:[#allocation23_spill] sm:$0xff] }
 0x15e   :  { %v1447_v22 = vrot.slane %v1446_v12, 4  ;;  %v1451_v51 = vrot.slane %v1449_v2, 5  ;;  %v646_v52 = vrot.slane %v644_v23, 4  ;;  %v658_v36 = vshrl.u32 %v583_v18, 16  ;;  %v1221_v10 = vld [vmem:[#allocation2 + $0x70] sm:$0xe] }
 0x15f   :  { %v649_v14 = vrot.slane %v647_v39, 5  ;;  %v655_v46 = vrot.slane %v653_v7, 5  ;;  %v661_v27 = vshll.u32 %v583_v18, 16  ;;  %v667_v26 = vshll.u32 %v3691_v20, 16  ;;  %v4754_v23 = vld [vmem:[#allocation24_spill] sm:$0xff] }
 0x160   :  { %1897 = vrot.lane.b32.xlu1 %v3006_v21, %s3310_s23  ;;  %v1452_v29 = vsel %vm3443_vm8, %v1447_v22, %v1451_v51  ;;  %v660_v11 = vrot.slane %v658_v36, 4  ;;  %v700_v5 = vshrl.u32 %v586_v17, 16  ;;  %v703_v41 = vshll.u32 %v586_v17, 16  ;;  %v3900_v39 = vld [vmem:[#allocation2 + $0x74] sm:$0x1] }
 0x161   :  { %v4752_v58 = vsel %vm3443_vm8, %v3439_v53, %v3441_v54  ;;  %v650_v37 = vor.u32 %v649_v14, %v646_v52  ;;  %v663_v62 = vrot.slane %v661_v27, 5  ;;  %v669_v43 = vrot.slane %v667_v26, 5 }
 0x162   :  { %v3030_v19 = vcombine.low %v1452_v29, %v4752_v58  ;;  %v702_v20 = vrot.slane %v700_v5, 4  ;;  %v705_v24 = vrot.slane %v703_v41, 5  ;;  %v709_v31 = vshll.u32 %v3709_v6, 16  ;;  %v3223_v6 = vld [vmem:[%s4715_s2 + $0x18] sm:$0xff]   ;;  %v4757_v41 = vld [vmem:[#allocation13_spill] sm:$0xff] }
 0x163   :  { %v714_v34 = vshrl.u32 %v587_v45, 16  ;;  %v651_v63 = vrot.slane %v650_v37, 4  ;;  %v664_v47 = vor.u32 %v663_v62, %v660_v11  ;;  %v717_v59 = vshll.u32 %v587_v45, 16  ;;  %3140 = vmatprep.subr.bf16.mxu1 %v3223_v6  ;;  %v4756_v5 = vld [vmem:[#allocation12_spill] sm:$0xff]  ;;  %v4758_v37 = vld [vmem:[#allocation10_spill] sm:$0xff] }
 0x164   :  { %v723_v35 = vshll.u32 %v3714_v56, 16  ;;  %2033 = vrot.lane.b32.xlu1 %v3030_v19, %s3311_s24  ;;  %v706_v53 = vor.u32 %v705_v24, %v702_v20  ;;  %v711_v54 = vrot.slane %v709_v31, 5  ;;  %v996_v25 = vshll.u32 %v4753_v9, 16  ;;  %3141 = vmatpush3.bf16.msra.mxu1 %v3223_v6  ;;  %v3915_v19 = vld [vmem:[#allocation2 + $0x64] sm:$0x1]  ;;  %v4760_v24 = vld [vmem:[#allocation11_spill] sm:$0xff] }
 0x165   :  { %v716_v0 = vrot.slane %v714_v34, 4  ;;  %v656_v18 = vsel %vm3443_vm8, %v651_v63, %v655_v46  ;;  %v665_v49 = vrot.slane %v664_v47, 4  ;;  %v719_v61 = vrot.slane %v717_v59, 5  ;;  %v4755_v46 = vld [vmem:[#allocation9_spill] sm:$0xff]  ;;  %v4761_v31 = vld [vmem:[#allocation14_spill] sm:$0xff] }
 0x166   :  { %v725_v12 = vrot.slane %v723_v35, 5  ;;  %v707_v56 = vrot.slane %v706_v53, 4  ;;  %v998_v2 = vrot.slane %v996_v25, 5  ;;  %v1010_v21 = vshll.u32 %v4754_v23, 16  ;;  %v4762_v63 = vld [vmem:[#allocation26_spill] sm:$0xff] }
 0x167   :  { %v2949_v7 = vrot.slane %v1220_v30, 9  ;;  %v670_v17 = vsel %vm3443_vm8, %v665_v49, %v669_v43  ;;  %v720_v22 = vor.u32 %v719_v61, %v716_v0  ;;  %v1300_v51 = vrot.slane %v3889_v4, 5  ;;  %v4759_v43 = vld [vmem:[#allocation25_spill] sm:$0xff]  ;;  %v850_v35 = vld [vmem:[#allocation2 + $0x68] sm:$0xe] }
 0x168   :  { %v2950_v52 = vrot.slane %v1221_v10, 9  ;;  %v2980_v36 = vcombine.low %v656_v18, %v670_v17  ;;  %v712_v14 = vsel %vm3443_vm8, %v707_v56, %v711_v54  ;;  %v999_v27 = vsel %vm3443_vm8, %v4755_v46, %v998_v2  ;;  %v849_v59 = vld [vmem:[#allocation2 + $0x60] sm:$0xe]  ;;  %v3929_v9 = vld [vmem:[#allocation2 + $0x6c] sm:$0x1] }
 0x169   :  { %v1012_v26 = vrot.slane %v1010_v21, 5  ;;  %v721_v45 = vrot.slane %v720_v22, 4  ;;  %v1301_v29 = vsel %vm3431_vm7, %v2949_v7, %v1300_v51  ;;  %v1304_v11 = vrot.slane %v3900_v39, 5  ;;  %v4763_v21 = vld [vmem:[#allocation15_spill] sm:$0xff]  ;;  %v4764_v7 = vld [vmem:[#allocation16_spill] sm:$0xff]  ;;  %v4766_v46 = vld [vmem:[#allocation18_spill] sm:$0xff] }
 0x16a   :  { %v1362_v58 = vor.u32 %v4757_v41, %v4756_v5  ;;  %1757 = vrot.lane.b32.xlu0 %v2980_v36, %s3303_s12  ;;  %v1365_v20 = vshll.u32 %v4759_v43, 16  ;;  %v1376_v34 = vor.u32 %v4761_v31, %v4760_v24  ;;  %v1379_v47 = vshll.u32 %v4762_v63, 16  ;;  %v1333_v51 = vld [vmem:[#allocation2 + $0x70] sm:$0xf] }
 0x16b   :  { %v1013_v62 = vsel %vm3443_vm8, %v4758_v37, %v1012_v26  ;;  %v726_v30 = vsel %vm3443_vm8, %v721_v45, %v725_v12  ;;  %v1305_v54 = vsel %vm3431_vm7, %v2950_v52, %v1304_v11  ;;  %v2933_v61 = vrot.slane %v849_v59, 9  ;;  %v1334_v45 = vld [vmem:[#allocation2 + $0x78] sm:$0xf] }
 0x16c   :  { %v3003_v53 = vcombine.low %v999_v27, %v1013_v62  ;;  %v1363_v0 = vrot.slane %v1362_v58, 4  ;;  %v2982_v25 = vcombine.low %v712_v14, %v726_v30  ;;  %v3016_v10 = vcombine.low %v1301_v29, %v1305_v54  ;;  %v4765_v14 = vld [vmem:[#allocation17_spill] sm:$0xff]  ;;  %v4768_v59 = vld [vmem:[#allocation20_spill] sm:$0xff]  ;;  %v3959_v30 = vld [vmem:[#allocation2 + $0x50] sm:$0xf] }
 0x16d   :  { %v1367_v6 = vrot.slane %v1365_v20, 5  ;;  %v1377_v18 = vrot.slane %v1376_v34, 4  ;;  %v1381_v49 = vrot.slane %v1379_v47, 5  ;;  %v932_v56 = vrot.slane %v3915_v19, 5  ;;  %v4767_v47 = vld [vmem:[#allocation19_spill] sm:$0xff] }
 0x16e   :  { %v2934_v2 = vrot.slane %v850_v35, 9  ;;  %1761 = vrot.lane.b32.xlu1 %v2982_v25, %s3303_s12  ;;  %1891 = vrot.lane.b32.xlu0 %v3003_v53, %s3310_s23  ;;  %v936_v23 = vrot.slane %v3929_v9, 5  ;;  %v1049_v17 = vor.u32 %v4764_v7, %v4763_v21  ;;  %v1052_v22 = vshll.u32 %v3744_v13, 16  ;;  %v3961_v53 = vld [vmem:[#allocation2 + $0x58] sm:$0xf] }
 0x16f   :  { %v1368_v12 = vsel %vm3443_vm8, %v1363_v0, %v1367_v6  ;;  %v1382_v52 = vsel %vm3443_vm8, %v1377_v18, %v1381_v49  ;;  %v933_v36 = vsel %vm3431_vm7, %v2933_v61, %v932_v56  ;;  %v1063_v27 = vor.u32 %v4766_v46, %v4765_v14  ;;  %v4769_v49 = vld [vmem:[#allocation21_spill] sm:$0xff]  ;;  %v4770_v61 = vld [vmem:[#allocation22_spill] sm:$0xff] }
 0x170   :  { %v1066_v26 = vshll.u32 %v3750_v60, 16  ;;  %v3027_v29 = vcombine.low %v1368_v12, %v1382_v52  ;;  %v937_v11 = vsel %vm3431_vm7, %v2934_v2, %v936_v23  ;;  %v1050_v5 = vrot.slane %v1049_v17, 4  ;;  %v604_v12 = vld [vmem:[#allocation2 + $0x54] sm:$0x1] }
 0x171   :  { %v1054_v41 = vrot.slane %v1052_v22, 5  ;;  %v2992_v13 = vcombine.low %v933_v36, %v937_v11  ;;  %v1064_v58 = vrot.slane %v1063_v27, 4  ;;  %v1496_v62 = vshrl.u32 %v1333_v51, 16  ;;  %v847_v22 = vld [vmem:[#allocation2 + $0x50] sm:$0xe] }
 0x172   :  { %v1068_v37 = vrot.slane %v1066_v26, 5  ;;  %1941 = vrot.lane.b32.xlu1 %v3016_v10, %s3309_s22  ;;  %2027 = vrot.lane.b32.xlu0 %v3027_v29, %s3311_s24  ;;  %v1499_v20 = vshll.u32 %v1333_v51, 16  ;;  %v1510_v60 = vshrl.u32 %v1334_v45, 16  ;;  %v1513_v24 = vshll.u32 %v1334_v45, 16  ;;  %v605_v36 = vld [vmem:[#allocation2 + $0x5c] sm:$0x1] }
 0x173   :  { %v1055_v43 = vsel %vm3443_vm8, %v1050_v5, %v1054_v41  ;;  %v3955_v34 = vrot.slane %v1496_v62, 4  ;;  %v3024_v63 = vcombine.low %v1333_v51, %v1334_v45  ;;  %v1418_v35 = vor.u32 %v4768_v59, %v4767_v47  ;;  %v848_v45 = vld [vmem:[#allocation2 + $0x58] sm:$0xe]  ;;  %v3986_v59 = vld [vmem:[#allocation2 + $0x5c] sm:$0x1] }
 0x174   :  { %v1069_v31 = vsel %vm3443_vm8, %v1064_v58, %v1068_v37  ;;  %v3963_v0 = vrot.slane %v1499_v20, 5  ;;  %v3965_v25 = vrot.slane %v1510_v60, 4  ;;  %v3967_v10 = vrot.slane %v1513_v24, 5  ;;  %v969_v20 = vld [vmem:[#allocation2 + $0x90] sm:$0xf] }
 0x175   :  { %v3005_v54 = vcombine.low %v1055_v43, %v1069_v31  ;;  %v1419_v6 = vrot.slane %v1418_v35, 4  ;;  %v1421_v18 = vshll.u32 %v3756_v15, 16  ;;  %v1432_v56 = vor.u32 %v4770_v61, %v4769_v49  ;;  %v3993_v49 = vld [vmem:[#allocation2 + $0x98] sm:$0xf] }
 0x176   :  { %v1435_v2 = vshll.u32 %v3761_v3, 16  ;;  %1805 = vrot.lane.b32.xlu1 %v2992_v13, %s3307_s20  ;;  %v728_v23 = vshrl.u32 %v3959_v30, 16  ;;  %v731_v21 = vshll.u32 %v3959_v30, 16  ;;  %v737_v7 = vshll.u32 %v604_v12, 16  ;;  %v3983_v13 = vld [vmem:[#allocation2 + $0x88] sm:$0xf] }
 0x177   :  { %1895 = vrot.lane.b32.xlu0 %v3005_v54, %s3310_s23  ;;  %v742_v17 = vshrl.u32 %v3961_v53, 16  ;;  %v1423_v51 = vrot.slane %v1421_v18, 5  ;;  %v1433_v15 = vrot.slane %v1432_v56, 4  ;;  %v745_v14 = vshll.u32 %v3961_v53, 16  ;;  %v1218_v18 = vld [vmem:[#allocation2 + $0x58] sm:$0xe] }
 0x178   :  { %v1437_v52 = vrot.slane %v1435_v2, 5  ;;  %v730_v3 = vrot.slane %v728_v23, 4  ;;  %v733_v46 = vrot.slane %v731_v21, 5  ;;  %v739_v27 = vrot.slane %v737_v7, 5  ;;  %v1219_v23 = vld [vmem:[#allocation2 + $0x60] sm:$0xe] }
 0x179   :  { %v744_v26 = vrot.slane %v742_v17, 4  ;;  %v1424_v29 = vsel %vm3443_vm8, %v1419_v6, %v1423_v51  ;;  %v747_v5 = vrot.slane %v745_v14, 5  ;;  %v751_v41 = vshll.u32 %v605_v36, 16  ;;  %v4003_v51 = vld [vmem:[#allocation2 + $0x64] sm:$0x1] }
 0x17a   :  { %v1438_v11 = vsel %vm3443_vm8, %v1433_v15, %v1437_v52  ;;  %1997 = vrot.lane.b32.xlu1 %v3024_v63, %s3306_s19  ;;  %v734_v37 = vor.u32 %v733_v46, %v730_v3  ;;  %v2931_v62 = vrot.slane %v847_v22, 9  ;;  %v924_v43 = vrot.slane %v604_v12, 5  ;;  %v1337_v15 = vld [vmem:[#allocation2 + $0x90] sm:$0xf]  ;;  %v1587_v46 = vld [vmem:[#allocation2 + $0x60] sm:$0xe] }
 0x17b   :  { %v3029_v58 = vcombine.low %v1424_v29, %v1438_v11  ;;  %v748_v60 = vor.u32 %v747_v5, %v744_v26  ;;  %v753_v24 = vrot.slane %v751_v41, 5  ;;  %v2932_v31 = vrot.slane %v848_v45, 9  ;;  %v4014_v11 = vld [vmem:[#allocation2 + $0x64] sm:$0x1] }
 0x17c   :  { %v928_v47 = vrot.slane %v605_v36, 5  ;;  %v735_v35 = vrot.slane %v734_v37, 4  ;;  %v925_v54 = vsel %vm3431_vm7, %v2931_v62, %v924_v43  ;;  %v1183_v6 = vshrl.u32 %v3983_v13, 16  ;;  %v1588_v62 = vld [vmem:[#allocation2 + $0x68] sm:$0xe] }
 0x17d   :  { %2031 = vrot.lane.b32.xlu0 %v3029_v58, %s3311_s24  ;;  %v1186_v63 = vshll.u32 %v3983_v13, 16  ;;  %v749_v61 = vrot.slane %v748_v60, 4  ;;  %v1197_v2 = vshrl.u32 %v969_v20, 16  ;;  %v1200_v12 = vshll.u32 %v969_v20, 16  ;;  %v4023_v60 = vld [vmem:[#allocation2 + $0x6c] sm:$0x1] }
 0x17e   :  { %v929_v56 = vsel %vm3431_vm7, %v2932_v31, %v928_v47  ;;  %v740_v21 = vsel %vm3443_vm8, %v735_v35, %v739_v27  ;;  %v3999_v17 = vrot.slane %v1183_v6, 4  ;;  %v3002_v3 = vcombine.low %v3983_v13, %v969_v20  ;;  %v966_v6 = vld [vmem:[#allocation2 + $0x78] sm:$0xf] }
 0x17f   :  { %v2991_v7 = vcombine.low %v925_v54, %v929_v56  ;;  %v4001_v22 = vrot.slane %v1186_v63, 5  ;;  %v754_v52 = vsel %vm3443_vm8, %v749_v61, %v753_v24  ;;  %v4007_v36 = vrot.slane %v1197_v2, 4 }
 0x180   :  { %v4009_v14 = vrot.slane %v1200_v12, 5  ;;  %v2983_v26 = vcombine.low %v740_v21, %v754_v52  ;;  %v2947_v27 = vrot.slane %v1218_v18, 9  ;;  %v1292_v45 = vrot.slane %v3986_v59, 5 }
 0x181   :  { %1803 = vrot.lane.b32.xlu0 %v2991_v7, %s3307_s20  ;;  %v2948_v29 = vrot.slane %v1219_v23, 9  ;;  %v1296_v5 = vrot.slane %v4003_v51, 5  ;;  %v1552_v41 = vshrl.u32 %v1337_v15, 16  ;;  %v1555_v58 = vshll.u32 %v1337_v15, 16 }
 0x182   :  { %v1566_v37 = vshrl.u32 %v3993_v49, 16  ;;  %1763 = vrot.lane.b32.xlu1 %v2983_v26, %s3303_s12  ;;  %v1293_v13 = vsel %vm3431_vm7, %v2947_v27, %v1292_v45  ;;  %v1569_v43 = vshll.u32 %v3993_v49, 16  ;;  %v3026_v20 = vcombine.low %v1337_v15, %v3993_v49  ;;  %v967_v15 = vld [vmem:[#allocation2 + $0x80] sm:$0xf] }
 0x183   :  { %v2963_v24 = vrot.slane %v1587_v46, 9  ;;  %v1297_v31 = vsel %vm3431_vm7, %v2948_v29, %v1296_v5  ;;  %v4027_v47 = vrot.slane %v1552_v41, 4  ;;  %v4029_v35 = vrot.slane %v1555_v58, 5  ;;  %v4049_v27 = vld [vmem:[#allocation2 + $0x60] sm:$0xf] }
 0x184   :  { %v4031_v54 = vrot.slane %v1566_v37, 4  ;;  %v3015_v63 = vcombine.low %v1293_v13, %v1297_v31  ;;  %v4033_v18 = vrot.slane %v1569_v43, 5  ;;  %v1661_v61 = vrot.slane %v4014_v11, 5  ;;  %v4055_v29 = vld [vmem:[#allocation2 + $0x68] sm:$0xf] }
 0x185   :  { %v2964_v56 = vrot.slane %v1588_v62, 9  ;;  %v1665_v49 = vrot.slane %v4023_v60, 5  ;;  %v1133_v2 = vor.u32 %v3766_v40, %v3764_v42  ;;  %v1136_v12 = vshll.u32 %v3889_v4, 16 }
 0x186   :  { %v1147_v23 = vor.u32 %v3771_v8, %v3769_v44  ;;  %1865 = vrot.lane.b32.xlu1 %v3002_v3, %s3305_s4  ;;  %1939 = vrot.lane.b32.xlu0 %v3015_v63, %s3309_s22  ;;  %v1662_v21 = vsel %vm3431_vm7, %v2963_v24, %v1661_v61  ;;  %v1150_v7 = vshll.u32 %v3900_v39, 16  ;;  %v1155_v52 = vshrl.u32 %v966_v6, 16  ;;  %v1335_v24 = vld [vmem:[#allocation2 + $0x80] sm:$0xf] }
 0x187   :  { %v1158_v46 = vshll.u32 %v966_v6, 16  ;;  %v1666_v42 = vsel %vm3431_vm7, %v2964_v56, %v1665_v49  ;;  %v1134_v40 = vrot.slane %v1133_v2, 4  ;;  %v1138_v4 = vrot.slane %v1136_v12, 5 }
 0x188   :  { %v1148_v26 = vrot.slane %v1147_v23, 4  ;;  %v3039_v44 = vcombine.low %v1662_v21, %v1666_v42  ;;  %v1152_v8 = vrot.slane %v1150_v7, 5  ;;  %v4051_v3 = vrot.slane %v1155_v52, 4  ;;  %v4072_v23 = vld [vmem:[#allocation2 + $0x8c] sm:$0x1] }
 0x189   :  { %v4053_v45 = vrot.slane %v1158_v46, 5  ;;  %v1139_v39 = vsel %vm3443_vm8, %v1134_v40, %v1138_v4  ;;  %v1169_v5 = vshrl.u32 %v967_v15, 16  ;;  %v1172_v41 = vshll.u32 %v967_v15, 16  ;;  %v1224_v21 = vld [vmem:[#allocation2 + $0x88] sm:$0xe] }
 0x18a   :  { %v3001_v58 = vcombine.low %v966_v6, %v967_v15  ;;  %2001 = vrot.lane.b32.xlu1 %v3026_v20, %s3306_s19  ;;  %2075 = vrot.lane.b32.xlu0 %v3039_v44, %s3308_s21  ;;  %v1153_v37 = vsel %vm3443_vm8, %v1148_v26, %v1152_v8  ;;  %v756_v62 = vshrl.u32 %v4049_v27, 16  ;;  %v759_v13 = vshll.u32 %v4049_v27, 16  ;;  %v1336_v20 = vld [vmem:[#allocation2 + $0x88] sm:$0xf]  ;;  %v4075_v46 = vld [vmem:[#allocation2 + $0x94] sm:$0x1]  ;;  %v4079_v8 = vpop.permute.xlu1 %1853 }
 0x18b   :  { %v765_v43 = vshll.u32 %v3915_v19, 16  ;;  %v3008_v31 = vcombine.low %v1139_v39, %v1153_v37  ;;  %v4066_v63 = vrot.slane %v1169_v5, 4  ;;  %v4068_v61 = vrot.slane %v1172_v41, 5  ;;  %v1225_v44 = vld [vmem:[#allocation2 + $0x90] sm:$0xe] }
 0x18c   :  { %v770_v6 = vshrl.u32 %v4055_v29, 16  ;;  %v758_v56 = vrot.slane %v756_v62, 4  ;;  %v761_v49 = vrot.slane %v759_v13, 5  ;;  %v773_v12 = vshll.u32 %v4055_v29, 16 }
 0x18d   :  { %v767_v2 = vrot.slane %v765_v43, 5  ;;  %v779_v19 = vshll.u32 %v3929_v9, 16  ;;  %v1524_v15 = vshrl.u32 %v1335_v24, 16  ;;  %v1527_v52 = vshll.u32 %v1335_v24, 16 }
 0x18e   :  { %v772_v7 = vrot.slane %v770_v6, 4  ;;  %1901 = vrot.lane.b32.xlu1 %v3008_v31, %s3310_s23  ;;  %1863 = vrot.lane.b32.xlu0 %v3001_v58, %s3305_s4  ;;  %v762_v42 = vor.u32 %v761_v49, %v758_v56  ;;  %v775_v40 = vrot.slane %v773_v12, 5  ;;  %v1538_v4 = vshrl.u32 %v1336_v20, 16 }
 0x18f   :  { %v1541_v26 = vshll.u32 %v1336_v20, 16  ;;  %v781_v39 = vrot.slane %v779_v19, 5  ;;  %v4081_v5 = vrot.slane %v1524_v15, 4  ;;  %v4083_v41 = vrot.slane %v1527_v52, 5  ;;  %v853_v19 = vld [vmem:[#allocation2 + $0x80] sm:$0xe] }
 0x190   :  { %v3025_v9 = vcombine.low %v1335_v24, %v1336_v20  ;;  %v763_v37 = vrot.slane %v762_v42, 4  ;;  %v776_v62 = vor.u32 %v775_v40, %v772_v7  ;;  %v4085_v13 = vrot.slane %v1538_v4, 4  ;;  %v4097_v7 = vld [vmem:[#allocation2 + $0x8c] sm:$0x1]  ;;  %v4108_v40 = vld [vmem:[#allocation2 + $0x84] sm:$0x1] }
 0x191   :  { %v4087_v43 = vrot.slane %v1541_v26, 5  ;;  %v2953_v58 = vrot.slane %v1224_v21, 9  ;;  %v1316_v31 = vrot.slane %v4072_v23, 5  ;;  %v2954_v6 = vrot.slane %v1225_v44, 9  ;;  %v4099_v21 = vpop.permute.xlu0 %1851  ;;  %v4112_v44 = vpop.permute.xlu1 %1989 }
 0x192   :  { %v1320_v56 = vrot.slane %v4075_v46, 5  ;;  %v768_v49 = vsel %vm3443_vm8, %v763_v37, %v767_v2  ;;  %v777_v12 = vrot.slane %v776_v62, 4  ;;  %1999 = vrot.lane.b32.xlu0 %v3025_v9, %s3306_s19  ;;  %v1105_v24 = vor.u32 %v3837_v16, %v3835_v48  ;;  %v854_v48 = vld [vmem:[#allocation2 + $0x88] sm:$0xe] }
 0x193   :  { %v1108_v20 = vshll.u32 %v3986_v59, 16  ;;  %v1317_v15 = vsel %vm3431_vm7, %v2953_v58, %v1316_v31  ;;  %v1119_v2 = vor.u32 %v3843_v57, %v3839_v38  ;;  %v1122_v42 = vshll.u32 %v4003_v51, 16 }
 0x194   :  { %v1321_v52 = vsel %vm3431_vm7, %v2954_v6, %v1320_v56  ;;  %v782_v16 = vsel %vm3443_vm8, %v777_v12, %v781_v39  ;;  %v1106_v4 = vrot.slane %v1105_v24, 4  ;;  %v2937_v58 = vrot.slane %v853_v19, 9 }
 0x195   :  { %v3018_v59 = vcombine.low %v1317_v15, %v1321_v52  ;;  %v1110_v26 = vrot.slane %v1108_v20, 5  ;;  %v2984_v9 = vcombine.low %v768_v49, %v782_v16  ;;  %v1120_v37 = vrot.slane %v1119_v2, 4  ;;  %v1349_v15 = vld [vmem:[#allocation2 + $0x74] sm:$0x1]  ;;  %v1589_v52 = vld [vmem:[#allocation2 + $0x70] sm:$0xe]  ;;  %v4131_v2 = vpop.permute.xlu0 %1987 }
 0x196   :  { %v1124_v62 = vrot.slane %v1122_v42, 5  ;;  %v948_v57 = vrot.slane %v4108_v40, 5  ;;  %v2938_v51 = vrot.slane %v854_v48, 9  ;;  %v952_v31 = vrot.slane %v4097_v7, 5 }
 0x197   :  { %v1111_v38 = vsel %vm3443_vm8, %v1106_v4, %v1110_v26  ;;  %1765 = vrot.lane.b32.xlu1 %v2984_v9, %s3303_s12  ;;  %v1474_v6 = vor.u32 %v3860_v32, %v3858_v28  ;;  %v1477_v56 = vshll.u32 %v4014_v11, 16  ;;  %v1488_v49 = vor.u32 %v3875_v1, %v3864_v33  ;;  %v1350_v1 = vld [vmem:[#allocation2 + $0x7c] sm:$0x1]  ;;  %v4138_v26 = vpop.permute.xlu1 %1857 }
 0x198   :  { %v1125_v39 = vsel %vm3443_vm8, %v1120_v37, %v1124_v62  ;;  %v949_v24 = vsel %vm3431_vm7, %v2937_v58, %v948_v57  ;;  %v953_v20 = vsel %vm3431_vm7, %v2938_v51, %v952_v31  ;;  %v1491_v19 = vshll.u32 %v4023_v60, 16  ;;  %v1590_v60 = vld [vmem:[#allocation2 + $0x78] sm:$0xe] }
 0x199   :  { %v3007_v12 = vcombine.low %v1111_v38, %v1125_v39  ;;  %v2994_v42 = vcombine.low %v949_v24, %v953_v20  ;;  %v1475_v28 = vrot.slane %v1474_v6, 4  ;;  %v1479_v32 = vrot.slane %v1477_v56, 5  ;;  %v4143_v38 = vld [vmem:[#allocation2 + $0x70] sm:$0xf]  ;;  %v4155_v20 = vpop.permute.xlu0 %1855 }
 0x19a   :  { %v1489_v11 = vrot.slane %v1488_v49, 4  ;;  %v1493_v33 = vrot.slane %v1491_v19, 5  ;;  %v1502_v48 = vor.u32 %v3963_v0, %v3955_v34  ;;  %v1505_v16 = vshll.u32 %v1349_v15, 16  ;;  %v608_v49 = vld [vmem:[#allocation2 + $0x74] sm:$0x1] }
 0x19b   :  { %1899 = vrot.lane.b32.xlu0 %v3007_v12, %s3310_s23  ;;  %v1516_v4 = vor.u32 %v3967_v10, %v3965_v25  ;;  %1945 = vrot.lane.b32.xlu1 %v3018_v59, %s3309_s22  ;;  %v1480_v9 = vsel %vm3443_vm8, %v1475_v28, %v1479_v32  ;;  %v1519_v37 = vshll.u32 %v1350_v1, 16  ;;  %v2965_v62 = vrot.slane %v1589_v52, 9  ;;  %v4147_v25 = vld [vmem:[#allocation2 + $0x78] sm:$0xf]  ;;  %v851_v32 = vld [vmem:[#allocation2 + $0x70] sm:$0xe] }
 0x19c   :  { %v1669_v58 = vrot.slane %v1349_v15, 5  ;;  %v1494_v34 = vsel %vm3443_vm8, %v1489_v11, %v1493_v33  ;;  %v1503_v0 = vrot.slane %v1502_v48, 4  ;;  %v1507_v57 = vrot.slane %v1505_v16, 5 }
 0x19d   :  { %v1517_v51 = vrot.slane %v1516_v4, 4  ;;  %v3031_v10 = vcombine.low %v1480_v9, %v1494_v34  ;;  %v1521_v31 = vrot.slane %v1519_v37, 5  ;;  %v2966_v39 = vrot.slane %v1590_v60, 9  ;;  %v852_v4 = vld [vmem:[#allocation2 + $0x78] sm:$0xe] }
 0x19e   :  { %v1670_v59 = vsel %vm3431_vm7, %v2965_v62, %v1669_v58  ;;  %v1508_v6 = vsel %vm3443_vm8, %v1503_v0, %v1507_v57  ;;  %v1673_v56 = vrot.slane %v1350_v1, 5  ;;  %v784_v12 = vshrl.u32 %v4143_v38, 16  ;;  %v609_v1 = vld [vmem:[#allocation2 + $0x7c] sm:$0x1] }
 0x19f   :  { %v787_v24 = vshll.u32 %v4143_v38, 16  ;;  %1809 = vrot.lane.b32.xlu1 %v2994_v42, %s3307_s20  ;;  %2035 = vrot.lane.b32.xlu0 %v3031_v10, %s3311_s24  ;;  %v1522_v19 = vsel %vm3443_vm8, %v1517_v51, %v1521_v31  ;;  %v793_v15 = vshll.u32 %v608_v49, 16  ;;  %v798_v52 = vshrl.u32 %v4147_v25, 16  ;;  %v4165_v42 = vpop.permute.xlu1 %1993  ;;  %v4167_v51 = vpop.permute.xlu0 %1991 }
 0x1a0   :  { %v801_v28 = vshll.u32 %v4147_v25, 16  ;;  %v3032_v11 = vcombine.low %v1508_v6, %v1522_v19  ;;  %v1674_v33 = vsel %vm3431_vm7, %v2966_v39, %v1673_v56  ;;  %v786_v48 = vrot.slane %v784_v12, 4  ;;  %v1222_v19 = vld [vmem:[#allocation2 + $0x78] sm:$0xe] }
 0x1a1   :  { %v789_v16 = vrot.slane %v787_v24, 5  ;;  %v3040_v60 = vcombine.low %v1670_v59, %v1674_v33  ;;  %v795_v9 = vrot.slane %v793_v15, 5  ;;  %v800_v37 = vrot.slane %v798_v52, 4  ;;  %v982_v59 = vld [vmem:[#allocation2 + $0x7c] sm:$0x1] }
 0x1a2   :  { %v803_v62 = vrot.slane %v801_v28, 5  ;;  %v807_v34 = vshll.u32 %v609_v1, 16  ;;  %v2935_v0 = vrot.slane %v851_v32, 9  ;;  %v940_v57 = vrot.slane %v608_v49, 5 }
 0x1a3   :  { %v790_v58 = vor.u32 %v789_v16, %v786_v48  ;;  %2037 = vrot.lane.b32.xlu1 %v3032_v11, %s3311_s24  ;;  %2077 = vrot.lane.b32.xlu0 %v3040_v60, %s3308_s21  ;;  %v2936_v31 = vrot.slane %v852_v4, 9  ;;  %v944_v39 = vrot.slane %v609_v1, 5  ;;  %v1189_v6 = vor.u32 %v4001_v22, %v3999_v17  ;;  %v1223_v11 = vld [vmem:[#allocation2 + $0x80] sm:$0xe]  ;;  %v983_v48 = vld [vmem:[#allocation2 + $0x84] sm:$0x1] }
 0x1a4   :  { %v804_v10 = vor.u32 %v803_v62, %v800_v37  ;;  %v809_v12 = vrot.slane %v807_v34, 5  ;;  %v941_v24 = vsel %vm3431_vm7, %v2935_v0, %v940_v57  ;;  %v1192_v49 = vshll.u32 %v4072_v23, 16  ;;  %v4183_v16 = vld [vmem:[#allocation2 + $0x80] sm:$0xf]  ;;  %v4185_v23 = vpop.permute.xlu1 %1795 }
 0x1a5   :  { %v791_v56 = vrot.slane %v790_v58, 4  ;;  %v945_v52 = vsel %vm3431_vm7, %v2936_v31, %v944_v39  ;;  %v1190_v28 = vrot.slane %v1189_v6, 4  ;;  %v1203_v32 = vor.u32 %v4009_v14, %v4007_v36  ;;  %v4189_v36 = vld [vmem:[#allocation2 + $0x88] sm:$0xf]  ;;  %v4191_v14 = vpop.permute.xlu0 %2069 }
 0x1a6   :  { %v805_v15 = vrot.slane %v804_v10, 4  ;;  %v2993_v22 = vcombine.low %v941_v24, %v945_v52  ;;  %v1194_v33 = vrot.slane %v1192_v49, 5  ;;  %v1206_v1 = vshll.u32 %v4075_v46, 16 }
 0x1a7   :  { %v796_v17 = vsel %vm3443_vm8, %v791_v56, %v795_v9  ;;  %v1204_v60 = vrot.slane %v1203_v32, 4  ;;  %v2951_v37 = vrot.slane %v1222_v19, 9  ;;  %v1308_v62 = vrot.slane %v982_v59, 5 }
 0x1a8   :  { %v810_v4 = vsel %vm3443_vm8, %v805_v15, %v809_v12  ;;  %1807 = vrot.lane.b32.xlu0 %v2993_v22, %s3307_s20  ;;  %v1195_v46 = vsel %vm3443_vm8, %v1190_v28, %v1194_v33  ;;  %v1208_v58 = vrot.slane %v1206_v1, 5  ;;  %v2952_v34 = vrot.slane %v1223_v11, 9  ;;  %v4206_v24 = vpop.permute.xlu1 %1933 }
 0x1a9   :  { %v2985_v9 = vcombine.low %v796_v17, %v810_v4  ;;  %v1309_v0 = vsel %vm3431_vm7, %v2951_v37, %v1308_v62  ;;  %v1312_v57 = vrot.slane %v983_v48, 5  ;;  %v812_v10 = vshrl.u32 %v4183_v16, 16  ;;  %v4210_v28 = vpop.permute.xlu0 %1799 }
 0x1aa   :  { %v815_v31 = vshll.u32 %v4183_v16, 16  ;;  %v1209_v39 = vsel %vm3443_vm8, %v1204_v60, %v1208_v58  ;;  %v821_v6 = vshll.u32 %v4108_v40, 16  ;;  %v826_v56 = vshrl.u32 %v4189_v36, 16 }
 0x1ab   :  { %1767 = vrot.lane.b32.xlu1 %v2985_v9, %s3303_s12  ;;  %v829_v12 = vshll.u32 %v4189_v36, 16  ;;  %v3010_v49 = vcombine.low %v1195_v46, %v1209_v39  ;;  %v1313_v19 = vsel %vm3431_vm7, %v2952_v34, %v1312_v57  ;;  %v814_v15 = vrot.slane %v812_v10, 4  ;;  %v1353_v10 = vld [vmem:[#allocation2 + $0x94] sm:$0x1] }
 0x1ac   :  { %v817_v52 = vrot.slane %v815_v31, 5  ;;  %v3017_v32 = vcombine.low %v1309_v0, %v1313_v19  ;;  %v823_v11 = vrot.slane %v821_v6, 5  ;;  %v828_v17 = vrot.slane %v826_v56, 4  ;;  %v4221_v46 = vpop.permute.xlu1 %1937  ;;  %v1593_v19 = vld [vmem:[#allocation2 + $0x90] sm:$0xe] }
 0x1ad   :  { %v831_v22 = vrot.slane %v829_v12, 5  ;;  %v835_v40 = vshll.u32 %v4097_v7, 16  ;;  %v1161_v1 = vor.u32 %v4053_v45, %v4051_v3  ;;  %v1164_v4 = vshll.u32 %v982_v59, 16  ;;  %v4223_v3 = vpop.permute.xlu0 %2073  ;;  %v1352_v12 = vld [vmem:[#allocation2 + $0x8c] sm:$0x1] }
 0x1ae   :  { %v818_v33 = vor.u32 %v817_v52, %v814_v15  ;;  %1943 = vrot.lane.b32.xlu0 %v3017_v32, %s3309_s22  ;;  %v1175_v37 = vor.u32 %v4068_v61, %v4066_v63  ;;  %v1178_v62 = vshll.u32 %v983_v48, 16  ;;  %v1558_v9 = vor.u32 %v4029_v35, %v4027_v47  ;;  %v1354_v47 = vld [vmem:[#allocation2 + $0x9c] sm:$0x1] }
 0x1af   :  { %1905 = vrot.lane.b32.xlu1 %v3010_v49, %s3310_s23  ;;  %v832_v60 = vor.u32 %v831_v22, %v828_v17  ;;  %v837_v7 = vrot.slane %v835_v40, 5  ;;  %v1162_v34 = vrot.slane %v1161_v1, 4  ;;  %v1166_v0 = vrot.slane %v1164_v4, 5  ;;  %v1351_v22 = vld [vmem:[#allocation2 + $0x84] sm:$0x1] }
 0x1b0   :  { %v819_v58 = vrot.slane %v818_v33, 4  ;;  %v1176_v59 = vrot.slane %v1175_v37, 4  ;;  %v1180_v57 = vrot.slane %v1178_v62, 5  ;;  %v1559_v31 = vrot.slane %v1558_v9, 4  ;;  %v4237_v15 = vpop.permute.xlu1 %1797  ;;  %v1592_v9 = vld [vmem:[#allocation2 + $0x88] sm:$0xe] }
 0x1b1   :  { %v833_v45 = vrot.slane %v832_v60, 4  ;;  %v1167_v61 = vsel %vm3443_vm8, %v1162_v34, %v1166_v0  ;;  %v1561_v35 = vshll.u32 %v1353_v10, 16  ;;  %v1572_v48 = vor.u32 %v4033_v18, %v4031_v54  ;;  %v1594_v54 = vld [vmem:[#allocation2 + $0x98] sm:$0xe]  ;;  %v4239_v18 = vpop.permute.xlu0 %1931  ;;  %v1591_v60 = vld [vmem:[#allocation2 + $0x80] sm:$0xe] }
 0x1b2   :  { %v824_v63 = vsel %vm3443_vm8, %v819_v58, %v823_v11  ;;  %v1181_v6 = vsel %vm3443_vm8, %v1176_v59, %v1180_v57  ;;  %v1575_v56 = vshll.u32 %v1354_v47, 16  ;;  %v1530_v49 = vor.u32 %v4083_v41, %v4081_v5 }
 0x1b3   :  { %v838_v39 = vsel %vm3443_vm8, %v833_v45, %v837_v7  ;;  %v3009_v32 = vcombine.low %v1167_v61, %v1181_v6  ;;  %v1563_v11 = vrot.slane %v1561_v35, 5  ;;  %v1573_v17 = vrot.slane %v1572_v48, 4 }
 0x1b4   :  { %v2986_v52 = vcombine.low %v824_v63, %v838_v39  ;;  %v1577_v33 = vrot.slane %v1575_v56, 5  ;;  %v1531_v40 = vrot.slane %v1530_v49, 4  ;;  %v1533_v1 = vshll.u32 %v1351_v22, 16  ;;  %v4249_v45 = vpop.permute.xlu1 %1801 }
 0x1b5   :  { %v1544_v4 = vor.u32 %v4087_v43, %v4085_v13  ;;  %1903 = vrot.lane.b32.xlu0 %v3009_v32, %s3310_s23  ;;  %v1564_v5 = vsel %vm3443_vm8, %v1559_v31, %v1563_v11  ;;  %v1547_v41 = vshll.u32 %v1352_v12, 16  ;;  %v2969_v37 = vrot.slane %v1593_v19, 9  ;;  %v4255_v35 = vpop.permute.xlu0 %2067 }
 0x1b6   :  { %1769 = vrot.lane.b32.xlu1 %v2986_v52, %s3303_s12  ;;  %v1685_v62 = vrot.slane %v1353_v10, 5  ;;  %v1578_v58 = vsel %vm3443_vm8, %v1573_v17, %v1577_v33  ;;  %v1535_v7 = vrot.slane %v1533_v1, 5  ;;  %v2970_v0 = vrot.slane %v1594_v54, 9 }
 0x1b7   :  { %v1545_v34 = vrot.slane %v1544_v4, 4  ;;  %v3034_v13 = vcombine.low %v1564_v5, %v1578_v58  ;;  %v1549_v43 = vrot.slane %v1547_v41, 5  ;;  %v1689_v57 = vrot.slane %v1354_v47, 5  ;;  %v3224_v47 = vld [vmem:[%s4715_s2 + $0x20] ss:$0 sps:$4 sm:$0xff]  }
 0x1b8   :  { %v1686_v59 = vsel %vm3431_vm7, %v2969_v37, %v1685_v62  ;;  %v1536_v31 = vsel %vm3443_vm8, %v1531_v40, %v1535_v7  ;;  %v2967_v63 = vrot.slane %v1591_v60, 9  ;;  %v1677_v10 = vrot.slane %v1351_v22, 5  ;;  %v4270_v55 = vpop.permute.xlu1 %1861  ;;  %3182 = vmatprep.subr.msk.bf16.mxu1 %vm2286_vm13, %v3224_v47  ;;  %v3229_v37 = vld [vmem:[#allocation2] sm:$0xf]  ;;  %v3230_v62 = vld [vmem:[#allocation2 + $0x8] sm:$0xf] }
 0x1b9   :  { %v2968_v61 = vrot.slane %v1592_v9, 9  ;;  %v1550_v48 = vsel %vm3443_vm8, %v1545_v34, %v1549_v43  ;;  %v1690_v39 = vsel %vm3431_vm7, %v2970_v0, %v1689_v57  ;;  %v1681_v6 = vrot.slane %v1352_v12, 5  ;;  %v4273_v32 = vpop.permute.xlu0 %1935  ;;  %v3231_v34 = vld [vmem:[#allocation2 + $0x10] sm:$0xf]  ;;  %v3232_v0 = vld [vmem:[#allocation2 + $0x18] sm:$0xf] }
 0x1ba   :  { %2041 = vrot.lane.b32.xlu1 %v3034_v13, %s3311_s24  ;;  %v3033_v56 = vcombine.low %v1536_v31, %v1550_v48  ;;  %v3042_v49 = vcombine.low %v1686_v59, %v1690_v39  ;;  %v1678_v19 = vsel %vm3431_vm7, %v2967_v63, %v1677_v10  ;;  %v2288_v11 = vsel %vm2286_vm13, %v3224_v47, 0  ;;  %v3233_v10 = vld [vmem:[#allocation2 + $0x30] sm:$0xf]  ;;  %v3235_v39 = vld [vmem:[#allocation2 + $0x20] sm:$0xf] }
 0x1bb   :  { %v1682_v52 = vsel %vm3431_vm7, %v2968_v61, %v1681_v6  ;;  %v2976_v17 = vcombine.low %v4049_v27, %v4055_v29  ;;  %3143 = vmatpush3.bf16.msra.mxu1 %v2288_v11  ;;  %v2977_v50 = vcombine.low %v4143_v38, %v4147_v25  ;;  %v2978_v22 = vcombine.low %v4183_v16, %v4189_v36  ;;  %v3234_v61 = vld [vmem:[#allocation2 + $0x38] sm:$0xf]  ;;  %v3236_v6 = vld [vmem:[#allocation2 + $0x28] sm:$0xf] }
 0x1bc   :  { %2039 = vrot.lane.b32.xlu0 %v3033_v56, %s3311_s24  ;;  %v3041_v12 = vcombine.low %v1678_v19, %v1682_v52  ;;  %v1894_v54 = vpop.permute.xlu1 %1893  ;;  %v2971_v9 = vcombine.low %v3229_v37, %v3230_v62  ;;  %v2972_v13 = vcombine.low %v3231_v34, %v3232_v0  ;;  %v2974_v48 = vcombine.low %v3233_v10, %v3234_v61 }
 0x1bd   :  { %v4284_v33 = vpop.permute.xlu0 %2071  ;;  %v2973_v56 = vcombine.low %v3235_v39, %v3236_v6  ;;  %v2975_v61 = vcombine.low %v3959_v30, %v3961_v53  ;;  %vm2592_vm7 = vcmask 1041409   ;;  %vm2595_vm8 = vcmask 1042434  }
 0x1be   :  { %2081 = vrot.lane.b32.xlu1 %v3042_v49, %s3308_s21  ;;  %vm2601_vm11 = vcmask 1044484   ;;  %vm2607_vm12 = vcmask 1046534  }
 0x1c0   :  { %2079 = vrot.lane.b32.xlu0 %v3041_v12, %s3308_s21  ;;  %v2030_v40 = vpop.permute.xlu1 %2029 }
 0x1c6   :  { %v1756_v1 = vpop.permute.xlu0 %1755 }
 0x1c7   :  { %v2086_v58 = vsel %vm2083_vm14, %v2971_v9, %v1756_v1 }
 0x1c8   :  { %v2110_v59 = vsel %vm2108_vm15, %v2086_v58, %v4185_v23 }
 0x1c9   :  { %v2127_v49 = vsel %vm2125_vm1, %v2110_v59, %v4099_v21 }
 0x1ca   :  { %v4286_v60 = vpop.permute.xlu0 %1859 }
 0x1ce   :  { %v1760_v4 = vpop.permute.xlu1 %1759 }
 0x1cf   :  { %v4288_v41 = vpop.permute.xlu0 %1995  ;;  %v2092_v12 = vsel %vm2083_vm14, %v2973_v56, %v1760_v4 }
 0x1d2   :  { %v1898_v5 = vpop.permute.xlu1 %1897 }
 0x1d6   :  { %v2034_v7 = vpop.permute.xlu1 %2033 }
 0x1dc   :  { %v1758_v43 = vpop.permute.xlu0 %1757 }
 0x1dd   :  { %v2089_v57 = vsel %vm2083_vm14, %v2972_v13, %v1758_v43 }
 0x1de   :  { %v2112_v31 = vsel %vm2108_vm15, %v2089_v57, %v4237_v15 }
 0x1df   :  { %v2129_v63 = vsel %vm2125_vm1, %v2112_v31, %v4079_v8 }
 0x1e0   :  { %v2145_v47 = vsel %vm89_vm0, %v2129_v63, %v1894_v54  ;;  %v1762_v23 = vpop.permute.xlu1 %1761  ;;  %v1892_v19 = vpop.permute.xlu0 %1891 }
 0x1e1   :  { %v2162_v15 = vsel %vm2158_vm2, %v2145_v47, %v4206_v24  ;;  %v2095_v52 = vsel %vm2083_vm14, %v2974_v48, %v1762_v23  ;;  %v2143_v8 = vsel %vm89_vm0, %v2127_v49, %v1892_v19 }
 0x1e2   :  { %v2116_v11 = vsel %vm2108_vm15, %v2095_v52, %v4249_v45  ;;  %v2160_v54 = vsel %vm2158_vm2, %v2143_v8, %v4239_v18  ;;  %v2179_v21 = vsel %vm2175_vm3, %v2162_v15, %v4112_v44  ;;  %v2114_v45 = vsel %vm2108_vm15, %v2092_v12, %v4210_v28 }
 0x1e3   :  { %v2133_v1 = vsel %vm2125_vm1, %v2116_v11, %v4138_v26  ;;  %v2177_v24 = vsel %vm2175_vm3, %v2160_v54, %v4131_v2  ;;  %v2196_v4 = vsel %vm2192_vm4, %v2179_v21, %v2030_v40  ;;  %v2131_v40 = vsel %vm2125_vm1, %v2114_v45, %v4155_v20 }
 0x1e4   :  { %v1942_v37 = vpop.permute.xlu1 %1941  ;;  %v2028_v62 = vpop.permute.xlu0 %2027  ;;  %v2149_v18 = vsel %vm89_vm0, %v2133_v1, %v1898_v5  ;;  %v2213_v2 = vsel %vm2209_vm5, %v2196_v4, %v4191_v14 }
 0x1e5   :  { %v2194_v9 = vsel %vm2192_vm4, %v2177_v24, %v2028_v62  ;;  %v2166_v28 = vsel %vm2158_vm2, %v2149_v18, %v4221_v46 }
 0x1e6   :  { %v2211_v44 = vsel %vm2209_vm5, %v2194_v9, %v4255_v35  ;;  %v2183_v34 = vsel %vm2175_vm3, %v2166_v28, %v4165_v42 }
 0x1e7   :  { %3144 = vmatprep.mubr.msk.bf16.mxu1 %vm2269_vm6, %v2211_v44  ;;  %v2200_v43 = vsel %vm2192_vm4, %v2183_v34, %v2034_v7 }
 0x1e8   :  { %v1806_v26 = vpop.permute.xlu1 %1805  ;;  %3145 = vmatmul.mubr.msk.bf16.vlgmr.msra.gmra.mrb[12].mxu1 %vm2269_vm6, %v2213_v2 }
 0x1e9   :  { %v1896_v58 = vpop.permute.xlu0 %1895 }
 0x1ea   :  { %v2147_v5 = vsel %vm89_vm0, %v2131_v40, %v1896_v58 }
 0x1eb   :  { %v2164_v35 = vsel %vm2158_vm2, %v2147_v5, %v4273_v32  ;;  %v2217_v32 = vsel %vm2209_vm5, %v2200_v43, %v4223_v3 }
 0x1ec   :  { %v2181_v14 = vsel %vm2175_vm3, %v2164_v35, %v4167_v51  ;;  %v1998_v0 = vpop.permute.xlu1 %1997 }
 0x1ef   :  { %v2032_v13 = vpop.permute.xlu0 %2031 }
 0x1f0   :  { %v2198_v20 = vsel %vm2192_vm4, %v2181_v14, %v2032_v13  ;;  %v2411_v13 = vld [vmem:[%s4716_s3] sm:$0xf] }
 0x1f1   :  { %v2215_v46 = vsel %vm2209_vm5, %v2198_v20, %v4284_v33  ;;  %3183 = vmatprep.subr.msk.bf16.mxu0 %vm2286_vm13, %v2411_v13  ;;  %v2444_v43 = vsel %vm2286_vm13, %v2411_v13, 0  ;;  %v3043_v20 = vld [vmem:[%s4718_s5] ss:$0 sm:$0xff]  ;;  %vm2610_vm13 = vcmask 1047559  }
 0x1f2   :  { %3148 = vmatprep.mubr.msk.bf16.mxu1 %vm2269_vm6, %v2215_v46  ;;  %3161 = vmatpush3.bf16.msra.mxu0 %v2444_v43  ;;  %v3237_v43 = vld [vmem:[#allocation3 + $0x10] sm:$0xff] }
 0x1f3   :  { %3149 = vmatmul.mubr.msk.bf16.gmra.mrb[16].mxu1 %vm2269_vm6, %v2217_v32  ;;  %v1804_v42 = vpop.permute.xlu0 %1803 }
 0x1f4   :  { %v1764_v59 = vpop.permute.xlu1 %1763 }
 0x1f5   :  { %v2098_v33 = vsel %vm2083_vm14, %v2975_v61, %v1764_v59 }
 0x1f6   :  { %v2118_v39 = vsel %vm2108_vm15, %v2098_v33, %v1804_v42 }
 0x1f7   :  { %v2135_v23 = vsel %vm2125_vm1, %v2118_v39, %v4286_v60 }
 0x1f8   :  { %v1866_v57 = vpop.permute.xlu1 %1865  ;;  %v1940_v51 = vpop.permute.xlu0 %1939 }
 0x1fc   :  { %v2076_v31 = vpop.permute.xlu0 %2075  ;;  %v2002_v63 = vpop.permute.xlu1 %2001 }
 0x200   :  { %v1864_v10 = vpop.permute.xlu0 %1863  ;;  %v1902_v7 = vpop.permute.xlu1 %1901 }
 0x204   :  { %v2000_v48 = vpop.permute.xlu0 %1999 }
 0x209   :  { %v1766_v6 = vpop.permute.xlu1 %1765 }
 0x20a   :  { %v2101_v3 = vsel %vm2083_vm14, %v2976_v17, %v1766_v6 }
 0x20b   :  { %v2120_v56 = vsel %vm2108_vm15, %v2101_v3, %v1806_v26 }
 0x20c   :  { %v2137_v47 = vsel %vm2125_vm1, %v2120_v56, %v4270_v55 }
 0x20d   :  { %v1900_v30 = vpop.permute.xlu0 %1899  ;;  %v1946_v53 = vpop.permute.xlu1 %1945  ;;  %v2153_v27 = vsel %vm89_vm0, %v2137_v47, %v1902_v7 }
 0x20e   :  { %v2151_v49 = vsel %vm89_vm0, %v2135_v23, %v1900_v30  ;;  %v2170_v55 = vsel %vm2158_vm2, %v2153_v27, %v1942_v37 }
 0x20f   :  { %v2168_v19 = vsel %vm2158_vm2, %v2151_v49, %v1940_v51  ;;  %v2187_v60 = vsel %vm2175_vm3, %v2170_v55, %v1998_v0 }
 0x210   :  { %v2185_v15 = vsel %vm2175_vm3, %v2168_v19, %v4288_v41 }
 0x211   :  { %v1810_v29 = vpop.permute.xlu1 %1809  ;;  %v2036_v17 = vpop.permute.xlu0 %2035 }
 0x212   :  { %v2202_v52 = vsel %vm2192_vm4, %v2185_v15, %v2036_v17 }
 0x213   :  { %v2219_v8 = vsel %vm2209_vm5, %v2202_v52, %v2076_v31 }
 0x214   :  { %3152 = vmatprep.mubr.msk.bf16.mxu1 %vm2269_vm6, %v2219_v8 }
 0x215   :  { %v2038_v12 = vpop.permute.xlu1 %2037  ;;  %v2078_v11 = vpop.permute.xlu0 %2077 }
 0x216   :  { %v2204_v54 = vsel %vm2192_vm4, %v2187_v60, %v2038_v12 }
 0x217   :  { %v2221_v41 = vsel %vm2209_vm5, %v2204_v54, %v2078_v11 }
 0x218   :  { %3153 = vmatmul.mubr.msk.bf16.gmra.mrb[20].mxu1 %vm2269_vm6, %v2221_v41 }
 0x21a   :  { %v1808_v21 = vpop.permute.xlu0 %1807 }
 0x21d   :  { %v1768_v1 = vpop.permute.xlu1 %1767 }
 0x21e   :  { %v2104_v37 = vsel %vm2083_vm14, %v2977_v50, %v1768_v1 }
 0x21f   :  { %v2122_v4 = vsel %vm2108_vm15, %v2104_v37, %v1808_v21 }
 0x220   :  { %v1944_v62 = vpop.permute.xlu0 %1943  ;;  %v2139_v44 = vsel %vm2125_vm1, %v2122_v4, %v1864_v10 }
 0x221   :  { %v1906_v24 = vpop.permute.xlu1 %1905 }
 0x227   :  { %v1904_v18 = vpop.permute.xlu0 %1903 }
 0x228   :  { %v1770_v45 = vpop.permute.xlu1 %1769  ;;  %v2155_v26 = vsel %vm89_vm0, %v2139_v44, %v1904_v18 }
 0x229   :  { %v2107_v9 = vsel %vm2083_vm14, %v2978_v22, %v1770_v45  ;;  %v2172_v50 = vsel %vm2158_vm2, %v2155_v26, %v1944_v62 }
 0x22a   :  { %v2124_v2 = vsel %vm2108_vm15, %v2107_v9, %v1810_v29  ;;  %v2189_v36 = vsel %vm2175_vm3, %v2172_v50, %v2000_v48 }
 0x22b   :  { %v2141_v40 = vsel %vm2125_vm1, %v2124_v2, %v1866_v57 }
 0x22c   :  { %v2157_v38 = vsel %vm89_vm0, %v2141_v40, %v1906_v24  ;;  %v2042_v25 = vpop.permute.xlu1 %2041 }
 0x22d   :  { %v2174_v58 = vsel %vm2158_vm2, %v2157_v38, %v1946_v53 }
 0x22e   :  { %v2191_v28 = vsel %vm2175_vm3, %v2174_v58, %v2002_v63  ;;  %v2040_v16 = vpop.permute.xlu0 %2039 }
 0x22f   :  { %v2208_v22 = vsel %vm2192_vm4, %v2191_v28, %v2042_v25  ;;  %v2206_v35 = vsel %vm2192_vm4, %v2189_v36, %v2040_v16 }
 0x230   :  { %v2082_v5 = vpop.permute.xlu1 %2081 }
 0x231   :  { %v2225_v0 = vsel %vm2209_vm5, %v2208_v22, %v2082_v5  ;;  %v4415_v5 = vld [vmem:[%s4719_s6] ss:$0 sm:$0xff]  ;;  %s3312_s6 = smov 96  }
 0x232   :  { %v2080_v34 = vpop.permute.xlu0 %2079 }
 0x233   :  { %v2223_v14 = vsel %vm2209_vm5, %v2206_v35, %v2080_v34 }
 0x234   :  { %3156 = vmatprep.mubr.msk.bf16.mxu1 %vm2269_vm6, %v2223_v14 }
 0x235   :  { %3157 = vmatmul.mubr.msk.bf16.gmra.mrb[24].mxu1 %vm2269_vm6, %v2225_v0 }
 0x2bb   :  { %v3146_v46 = vpop.f32.mrb[12].mxu1 }
 0x2bc   :  { %v2333_v32 = vadd.f32 %v3146_v46, %v3043_v20  ;;  %v2324_v42 = vpop.f32.mrb[13].mxu1 }
 0x2bd   :  { %v2325_v59 = vadd.f32 %v3043_v20, %v2324_v42  ;;  %v3147_v57 = vpop.f32.mrb[14].mxu1  ;;  %v3238_v42 = vld [vmem:[#allocation3] sm:$0xff] }
 0x2be   :  { %v2336_v51 = vadd.f32 %v3147_v57, %v3043_v20  ;;  %v2327_v31 = vpop.f32.mrb[15].mxu1  ;;  %v2389_v10 = vmax.f32 %v2333_v32, 0.0 }
 0x2bf   :  { %v2328_v63 = vadd.f32 %v3043_v20, %v2327_v31  ;;  %v2387_v61 = vmax.f32 %v2325_v59, 0.0  ;;  %v3239_v31 = vld [vmem:[#allocation3 + $0x18] sm:$0xff] }
 0x2c0   :  { %v2390_v7 = vmax.f32 %v2336_v51, 0.0 }
 0x2c1   :  { %v2388_v33 = vmax.f32 %v2328_v63, 0.0 }
 0x2c2   :  { %v2404_v48 = vpack.c.bf16 %v2390_v7, %v2389_v10  ;;  %v3240_v7 = vld [vmem:[#allocation3 + $0x8] sm:$0xff] }
 0x2c3   :  { %v2403_v39 = vpack.c.bf16 %v2388_v33, %v2387_v61 }
 0x2c5   :  { %3162 = vmatprep.mubr.msk.bf16.mxu0 %vm2083_vm14, %v2403_v39 }
 0x2c6   :  { %v3150_v6 = vpop.f32.mrb[16].mxu1  ;;  %3163 = vmatmul.mubr.msk.bf16.vlgmr.msra.gmra.mrb[4].mxu0 %vm2083_vm14, %v2404_v48 }
 0x2c7   :  { %v2349_v3 = vadd.f32 %v3150_v6, %v3043_v20  ;;  %v2340_v56 = vpop.f32.mrb[17].mxu1 }
 0x2c8   :  { %v2341_v47 = vadd.f32 %v3043_v20, %v2340_v56  ;;  %v3151_v23 = vpop.f32.mrb[18].mxu1 }
 0x2c9   :  { %v2352_v30 = vadd.f32 %v3151_v23, %v3043_v20  ;;  %v2343_v53 = vpop.f32.mrb[19].mxu1  ;;  %v2393_v19 = vmax.f32 %v2349_v3, 0.0 }
 0x2ca   :  { %v2344_v49 = vadd.f32 %v3043_v20, %v2343_v53  ;;  %v2391_v27 = vmax.f32 %v2341_v47, 0.0 }
 0x2cb   :  { %v2394_v15 = vmax.f32 %v2352_v30, 0.0 }
 0x2cc   :  { %v2392_v29 = vmax.f32 %v2344_v49, 0.0 }
 0x2cd   :  { %v2406_v17 = vpack.c.bf16 %v2394_v15, %v2393_v19 }
 0x2ce   :  { %v2405_v52 = vpack.c.bf16 %v2392_v29, %v2391_v27 }
 0x2d0   :  { %3166 = vmatprep.mubr.msk.bf16.mxu0 %vm2083_vm14, %v2405_v52 }
 0x2d1   :  { %3167 = vmatmul.mubr.msk.bf16.gmra.mrb[8].mxu0 %vm2083_vm14, %v2406_v17 }
 0x2eb   :  { %v3154_v55 = vpop.f32.mrb[20].mxu1 }
 0x2ec   :  { %v2365_v8 = vadd.f32 %v3154_v55, %v3043_v20  ;;  %v2356_v60 = vpop.f32.mrb[21].mxu1 }
 0x2ed   :  { %v2357_v12 = vadd.f32 %v3043_v20, %v2356_v60  ;;  %v3155_v11 = vpop.f32.mrb[22].mxu1 }
 0x2ee   :  { %v2368_v54 = vadd.f32 %v3155_v11, %v3043_v20  ;;  %v2359_v41 = vpop.f32.mrb[23].mxu1  ;;  %v2397_v1 = vmax.f32 %v2365_v8, 0.0 }
 0x2ef   :  { %v2360_v21 = vadd.f32 %v3043_v20, %v2359_v41  ;;  %v2395_v62 = vmax.f32 %v2357_v12, 0.0 }
 0x2f0   :  { %v2398_v24 = vmax.f32 %v2368_v54, 0.0 }
 0x2f1   :  { %v2396_v37 = vmax.f32 %v2360_v21, 0.0 }
 0x2f2   :  { %v2408_v4 = vpack.c.bf16 %v2398_v24, %v2397_v1 }
 0x2f3   :  { %v2407_v45 = vpack.c.bf16 %v2396_v37, %v2395_v62  ;;  %v3241_v62 = vld [vmem:[#allocation3 + $0x30] sm:$0xff] }
 0x2f5   :  { %3170 = vmatprep.mubr.msk.bf16.mxu0 %vm2083_vm14, %v2407_v45 }
 0x2f6   :  { %3171 = vmatmul.mubr.msk.bf16.gmra.mrb[12].mxu0 %vm2083_vm14, %v2408_v4 }
 0x308   :  { %v3158_v18 = vpop.f32.mrb[24].mxu1 }
 0x309   :  { %v2381_v9 = vadd.f32 %v3158_v18, %v3043_v20  ;;  %v2372_v44 = vpop.f32.mrb[25].mxu1 }
 0x30a   :  { %v2373_v2 = vadd.f32 %v3043_v20, %v2372_v44  ;;  %v3159_v26 = vpop.f32.mrb[26].mxu1  ;;  %v3242_v44 = vld [vmem:[#allocation3 + $0x20] sm:$0xff] }
 0x30b   :  { %v2384_v40 = vadd.f32 %v3159_v26, %v3043_v20  ;;  %v2375_v38 = vpop.f32.mrb[27].mxu1  ;;  %v2401_v50 = vmax.f32 %v2381_v9, 0.0 }
 0x30c   :  { %v2376_v25 = vadd.f32 %v3043_v20, %v2375_v38  ;;  %v2399_v28 = vmax.f32 %v2373_v2, 0.0 }
 0x30d   :  { %v2402_v58 = vmax.f32 %v2384_v40, 0.0 }
 0x30e   :  { %v2400_v16 = vmax.f32 %v2376_v25, 0.0 }
 0x30f   :  { %v2410_v36 = vpack.c.bf16 %v2402_v58, %v2401_v50  ;;  %v3243_v50 = vld [vmem:[#allocation3 + $0x38] sm:$0xff] }
 0x310   :  { %v2409_v22 = vpack.c.bf16 %v2400_v16, %v2399_v28 }
 0x312   :  { %3174 = vmatprep.mubr.msk.bf16.mxu0 %vm2083_vm14, %v2409_v22  ;;  %v3244_v22 = vld [vmem:[#allocation3 + $0x28] sm:$0xff] }
 0x313   :  { %3175 = vmatmul.mubr.msk.bf16.gmra.mrb[16].mxu0 %vm2083_vm14, %v2410_v36  ;;  %vm2866_vm14 = vcmask 785408  }
 0x399   :  { %v3164_v35 = vpop.f32.mrb[4].mxu0 }
 0x39a   :  { %v2489_v34 = vadd.f32 %v3164_v35, %v4415_v5  ;;  %v2480_v14 = vpop.f32.mrb[5].mxu0 }
 0x39b   :  { %v2481_v0 = vadd.f32 %v4415_v5, %v2480_v14  ;;  %v3165_v13 = vpop.f32.mrb[6].mxu0 }
 0x39c   :  { %v2545_v20 = vadd.f32 %v3237_v43, %v2489_v34  ;;  %v2492_v46 = vadd.f32 %v3165_v13, %v4415_v5  ;;  %v2483_v32 = vpop.f32.mrb[7].mxu0 }
 0x39d   :  { %v2543_v59 = vadd.f32 %v3238_v42, %v2481_v0  ;;  %v2484_v57 = vadd.f32 %v4415_v5, %v2483_v32 }
 0x39e   :  { %v4421_v51 = vmax.f32 %v2545_v20, 0.0  ;;  %v2546_v63 = vadd.f32 %v3239_v31, %v2492_v46 }
 0x39f   :  { %v4423_v10 = vmax.f32 %v2543_v59, 0.0  ;;  %v2544_v61 = vadd.f32 %v3240_v7, %v2484_v57 }
 0x3a0   :  { %v4425_v33 = vmax.f32 %v2546_v63, 0.0  ;;  %v2763_v48 = vrot.slane %v4421_v51, 3  ;;  %v2630_v39 = vrot.slane %v4421_v51, 7  ;;  %v2797_v6 = vrot.slane %v4421_v51, 4 }
 0x3a1   :  { %v4430_v3 = vmax.f32 %v2544_v61, 0.0  ;;  %v2760_v56 = vrot.slane %v4423_v10, 5  ;;  %v2628_v47 = vrot.slane %v4423_v10, 1  ;;  %v2662_v23 = vrot.slane %v4423_v10, 2 }
 0x3a2   :  { %v2765_v30 = vrot.slane %v4425_v33, 2  ;;  %v2632_v53 = vrot.slane %v4425_v33, 6  ;;  %v2666_v49 = vrot.slane %v4425_v33, 7  ;;  %v2794_v19 = vrot.slane %v4423_v10, 6 }
 0x3a3   :  { %v2761_v27 = vrot.slane %v4430_v3, 4  ;;  %v2629_v29 = vsel %vm2592_vm7, %v4430_v3, %v2628_v47  ;;  %v2663_v17 = vrot.slane %v4430_v3, 1  ;;  %v2795_v52 = vrot.slane %v4430_v3, 5 }
 0x3a4   :  { %v3168_v15 = vpop.f32.mrb[8].mxu0  ;;  %v2631_v60 = vsel %vm2595_vm8, %v2630_v39, %v2629_v29  ;;  %v2799_v12 = vrot.slane %v4425_v33, 3  ;;  %v2696_v11 = vrot.slane %v4423_v10, 3  ;;  %v2697_v16 = vrot.slane %v4430_v3, 2 }
 0x3a5   :  { %v2505_v55 = vadd.f32 %v3168_v15, %v4415_v5  ;;  %v2496_v8 = vpop.f32.mrb[9].mxu0  ;;  %v2762_v21 = vsel %vm2592_vm7, %v2761_v27, %v2760_v56  ;;  %v2633_v1 = vsel %vm2598_vm9, %v2632_v53, %v2631_v60  ;;  %v2664_v24 = vsel %vm2592_vm7, %v2663_v17, %v2662_v23 }
 0x3a6   :  { %v2497_v54 = vadd.f32 %v4415_v5, %v2496_v8  ;;  %v3169_v41 = vpop.f32.mrb[10].mxu0  ;;  %v2764_v18 = vsel %vm2595_vm8, %v2763_v48, %v2762_v21  ;;  %v2665_v9 = vsel %vm2595_vm8, %v4421_v51, %v2664_v24  ;;  %v2796_v28 = vsel %vm2592_vm7, %v2795_v52, %v2794_v19 }
 0x3a7   :  { %v2549_v37 = vadd.f32 %v3241_v62, %v2505_v55  ;;  %v2508_v4 = vadd.f32 %v3169_v41, %v4415_v5  ;;  %v2499_v45 = vpop.f32.mrb[11].mxu0  ;;  %v2766_v40 = vsel %vm2598_vm9, %v2765_v30, %v2764_v18  ;;  %v2667_v38 = vsel %vm2598_vm9, %v2666_v49, %v2665_v9 }
 0x3a8   :  { %v2547_v2 = vadd.f32 %v3242_v44, %v2497_v54  ;;  %v2500_v26 = vadd.f32 %v4415_v5, %v2499_v45  ;;  %v2798_v34 = vsel %vm2595_vm8, %v2797_v6, %v2796_v28  ;;  %v2699_v14 = vrot.slane %v4421_v51, 1 }
 0x3a9   :  { %v4459_v25 = vmax.f32 %v2549_v37, 0.0  ;;  %v2550_v58 = vadd.f32 %v3243_v50, %v2508_v4  ;;  %v2800_v7 = vsel %vm2598_vm9, %v2799_v12, %v2798_v34  ;;  %v2698_v15 = vsel %vm2592_vm7, %v2697_v16, %v2696_v11 }
 0x3aa   :  { %v4463_v36 = vmax.f32 %v2547_v2, 0.0  ;;  %v2548_v35 = vadd.f32 %v3244_v22, %v2500_v26  ;;  %v2700_v12 = vsel %vm2595_vm8, %v2699_v14, %v2698_v15  ;;  %v2828_v45 = vrot.slane %v4423_v10, 7 }
 0x3ab   :  { %v4467_v0 = vmax.f32 %v2550_v58, 0.0  ;;  %v2770_v13 = vrot.slane %v4459_v25, 7  ;;  %v2638_v43 = vrot.slane %v4459_v25, 3  ;;  %v2672_v20 = vrot.slane %v4459_v25, 4 }
 0x3ac   :  { %v4472_v46 = vmax.f32 %v2548_v35, 0.0  ;;  %v2767_v32 = vrot.slane %v4463_v36, 1  ;;  %v2634_v42 = vrot.slane %v4463_v36, 5  ;;  %v2668_v59 = vrot.slane %v4463_v36, 6 }
 0x3ad   :  { %v2772_v57 = vrot.slane %v4467_v0, 6  ;;  %v2640_v31 = vrot.slane %v4467_v0, 2  ;;  %v2674_v63 = vrot.slane %v4467_v0, 3  ;;  %v2801_v23 = vrot.slane %v4463_v36, 2 }
 0x3ae   :  { %v2768_v61 = vsel %vm2601_vm11, %v2767_v32, %v2766_v40  ;;  %v2635_v48 = vsel %vm2601_vm11, %v2634_v42, %v2633_v1  ;;  %v2636_v39 = vrot.slane %v4472_v46, 4  ;;  %v2669_v6 = vsel %vm2601_vm11, %v2668_v59, %v2667_v38 }
 0x3af   :  { %v2769_v56 = vsel %vm2604_vm10, %v4472_v46, %v2768_v61  ;;  %v2670_v47 = vrot.slane %v4472_v46, 5  ;;  %v2803_v30 = vrot.slane %v4472_v46, 1  ;;  %v2806_v19 = vrot.slane %v4467_v0, 7 }
 0x3b0   :  { %v2771_v53 = vsel %vm2607_vm12, %v2770_v13, %v2769_v56  ;;  %v2637_v49 = vsel %vm2604_vm10, %v2636_v39, %v2635_v48  ;;  %v2802_v52 = vsel %vm2601_vm11, %v2801_v23, %v2800_v7  ;;  %v2701_v41 = vsel %vm2598_vm9, %v4425_v33, %v2700_v12 }
 0x3b1   :  { %v2773_v27 = vsel %vm2610_vm13, %v2772_v57, %v2771_v53  ;;  %v2639_v29 = vsel %vm2607_vm12, %v2638_v43, %v2637_v49  ;;  %v2671_v17 = vsel %vm2604_vm10, %v2670_v47, %v2669_v6  ;;  %v2804_v60 = vsel %vm2604_vm10, %v2803_v30, %v2802_v52 }
 0x3b2   :  { %2788 = vrot.lane.b32.xlu0 %v2773_v27, %s3310_s23  ;;  %v2641_v55 = vsel %vm2610_vm13, %v2640_v31, %v2639_v29  ;;  %v2673_v8 = vsel %vm2607_vm12, %v2672_v20, %v2671_v17  ;;  %v2805_v54 = vsel %vm2607_vm12, %v4459_v25, %v2804_v60  ;;  %v2702_v21 = vrot.slane %v4463_v36, 7 }
 0x3b3   :  { %v2675_v11 = vsel %vm2610_vm13, %v2674_v63, %v2673_v8  ;;  %v2807_v1 = vsel %vm2610_vm13, %v2806_v19, %v2805_v54  ;;  %v2704_v24 = vrot.slane %v4472_v46, 6  ;;  %v2706_v62 = vrot.slane %v4459_v25, 5  ;;  %v3245_v8 = vld [vmem:[#allocation3 + $0x50] sm:$0xff] }
 0x3b4   :  { %v2703_v37 = vsel %vm2601_vm11, %v2702_v21, %v2701_v41  ;;  %v2708_v4 = vrot.slane %v4467_v0, 4  ;;  %v2829_v18 = vrot.slane %v4430_v3, 6  ;;  %v2831_v44 = vrot.slane %v4421_v51, 5 }
 0x3b5   :  { %v2705_v9 = vsel %vm2604_vm10, %v2704_v24, %v2703_v37  ;;  %v2833_v2 = vrot.slane %v4425_v33, 4  ;;  %v2835_v26 = vrot.slane %v4463_v36, 3  ;;  %v2837_v50 = vrot.slane %v4472_v46, 2  ;;  %v3248_v37 = vld [vmem:[#allocation3 + $0x48] sm:$0xff] }
 0x3b6   :  { %2656 = vrot.lane.b32.xlu0 %v2641_v55, %s3310_s23  ;;  %v2707_v40 = vsel %vm2607_vm12, %v2706_v62, %v2705_v9  ;;  %v2830_v38 = vsel %vm2592_vm7, %v2829_v18, %v2828_v45  ;;  %v2839_v58 = vrot.slane %v4459_v25, 1  ;;  %v2730_v22 = vrot.slane %v4423_v10, 4 }
 0x3b7   :  { %v2709_v28 = vsel %vm2610_vm13, %v2708_v4, %v2707_v40  ;;  %v2832_v16 = vsel %vm2595_vm8, %v2831_v44, %v2830_v38  ;;  %v2731_v35 = vrot.slane %v4430_v3, 3  ;;  %v2733_v14 = vrot.slane %v4421_v51, 2 }
 0x3b8   :  { %v2834_v34 = vsel %vm2598_vm9, %v2833_v2, %v2832_v16  ;;  %v2735_v13 = vrot.slane %v4425_v33, 1  ;;  %v2738_v43 = vrot.slane %v4472_v46, 7  ;;  %v2740_v42 = vrot.slane %v4459_v25, 6 }
 0x3b9   :  { %v2836_v20 = vsel %vm2601_vm11, %v2835_v26, %v2834_v34  ;;  %v2732_v32 = vsel %vm2592_vm7, %v2731_v35, %v2730_v22  ;;  %v2591_v59 = vrot.slane %v4430_v3, 7  ;;  %v2594_v63 = vrot.slane %v4421_v51, 6 }
 0x3ba   :  { %2690 = vrot.lane.b32.xlu0 %v2675_v11, %s3308_s21  ;;  %v2838_v57 = vsel %vm2604_vm10, %v2837_v50, %v2836_v20  ;;  %v2734_v31 = vsel %vm2595_vm8, %v2733_v14, %v2732_v32  ;;  %v2597_v7 = vrot.slane %v4425_v33, 5  ;;  %v2600_v6 = vrot.slane %v4463_v36, 4  ;;  %v3246_v11 = vld [vmem:[#allocation3 + $0x40] sm:$0xff] }
 0x3bb   :  { %v2840_v61 = vsel %vm2607_vm12, %v2839_v58, %v2838_v57  ;;  %v2736_v48 = vsel %vm2598_vm9, %v2735_v13, %v2734_v31  ;;  %v2593_v39 = vsel %vm2592_vm7, %v2591_v59, %v4423_v10  ;;  %v2603_v51 = vrot.slane %v4472_v46, 3 }
 0x3bc   :  { %v2841_v3 = vsel %vm2610_vm13, %v4467_v0, %v2840_v61  ;;  %v2737_v56 = vsel %vm2601_vm11, %v4463_v36, %v2736_v48  ;;  %v2596_v47 = vsel %vm2595_vm8, %v2594_v63, %v2593_v39  ;;  %v2742_v23 = vrot.slane %v4467_v0, 5 }
 0x3bd   :  { %v2739_v33 = vsel %vm2604_vm10, %v2738_v43, %v2737_v56  ;;  %v2599_v10 = vsel %vm2598_vm9, %v2597_v7, %v2596_v47  ;;  %v2606_v49 = vrot.slane %v4459_v25, 2  ;;  %v2609_v46 = vrot.slane %v4467_v0, 1 }
 0x3be   :  { %2822 = vrot.lane.b32.xlu0 %v2807_v1, %s3308_s21  ;;  %v2741_v30 = vsel %vm2607_vm12, %v2740_v42, %v2739_v33  ;;  %v2602_v53 = vsel %vm2601_vm11, %v2600_v6, %v2599_v10  ;;  %v3247_v1 = vld [vmem:[#allocation3 + $0x58] sm:$0xff] }
 0x3bf   :  { %v4561_v36 = vsel %vm2610_vm13, %v2742_v23, %v2741_v30  ;;  %v2605_v19 = vsel %vm2604_vm10, %v2603_v51, %v2602_v53 }
 0x3c0   :  { %v2608_v15 = vsel %vm2607_vm12, %v2606_v49, %v2605_v19 }
 0x3c1   :  { %v4568_v27 = vsel %vm2610_vm13, %v2609_v46, %v2608_v15 }
 0x3c2   :  { %2724 = vrot.lane.b32.xlu0 %v2709_v28, %s3312_s6 }
 0x3c6   :  { %2856 = vrot.lane.b32.xlu0 %v2841_v3, %s3312_s6 }
 0x3c9   :  { %v3172_v29 = vpop.f32.mrb[12].mxu0 }
 0x3ca   :  { %v2521_v25 = vadd.f32 %v3172_v29, %v4415_v5  ;;  %v2512_v17 = vpop.f32.mrb[13].mxu0 }
 0x3cb   :  { %v2513_v52 = vadd.f32 %v4415_v5, %v2512_v17  ;;  %v3173_v55 = vpop.f32.mrb[14].mxu0 }
 0x3cc   :  { %v2553_v60 = vadd.f32 %v3245_v8, %v2521_v25  ;;  %v2524_v0 = vadd.f32 %v3173_v55, %v4415_v5  ;;  %v2515_v12 = vpop.f32.mrb[15].mxu0 }
 0x3cd   :  { %v2551_v54 = vadd.f32 %v3246_v11, %v2513_v52  ;;  %v2516_v41 = vadd.f32 %v4415_v5, %v2515_v12 }
 0x3ce   :  { %v2569_v21 = vmax.f32 %v2553_v60, 0.0  ;;  %v2554_v24 = vadd.f32 %v3247_v1, %v2524_v0 }
 0x3cf   :  { %v2567_v62 = vmax.f32 %v2551_v54, 0.0  ;;  %v2552_v4 = vadd.f32 %v3248_v37, %v2516_v41 }
 0x3d0   :  { %v2570_v45 = vmax.f32 %v2554_v24, 0.0  ;;  %v2777_v18 = vrot.slane %v2569_v21, 3  ;;  %v2644_v9 = vrot.slane %v2569_v21, 7  ;;  %v2811_v44 = vrot.slane %v2569_v21, 4 }
 0x3d1   :  { %v2568_v2 = vmax.f32 %v2552_v4, 0.0  ;;  %v2774_v26 = vrot.slane %v2567_v62, 5  ;;  %v2642_v40 = vrot.slane %v2567_v62, 1  ;;  %v2676_v38 = vrot.slane %v2567_v62, 2  ;;  %v3249_v4 = vld [vmem:[#allocation3 + $0x70] sm:$0xff] }
 0x3d2   :  { %v2779_v50 = vrot.slane %v2570_v45, 2  ;;  %v2646_v58 = vrot.slane %v2570_v45, 6  ;;  %v2680_v28 = vrot.slane %v2570_v45, 7  ;;  %v2808_v16 = vrot.slane %v2567_v62, 6 }
 0x3d3   :  { %v2775_v22 = vrot.slane %v2568_v2, 4  ;;  %v2643_v35 = vsel %vm2592_vm7, %v2568_v2, %v2642_v40  ;;  %v2677_v34 = vrot.slane %v2568_v2, 1  ;;  %v2809_v14 = vrot.slane %v2568_v2, 5  ;;  %v3251_v40 = vld [vmem:[#allocation3 + $0x78] sm:$0xff] }
 0x3d4   :  { %v2645_v13 = vsel %vm2595_vm8, %v2644_v9, %v2643_v35  ;;  %v2813_v43 = vrot.slane %v2570_v45, 3  ;;  %v2710_v20 = vrot.slane %v2567_v62, 3  ;;  %v2711_v32 = vrot.slane %v2568_v2, 2  ;;  %v3250_v9 = vld [vmem:[#allocation3 + $0x60] sm:$0xff] }
 0x3d5   :  { %v2776_v42 = vsel %vm2592_vm7, %v2775_v22, %v2774_v26  ;;  %v4579_v59 = vsel %vm2598_vm9, %v2646_v58, %v2645_v13  ;;  %v2678_v57 = vsel %vm2592_vm7, %v2677_v34, %v2676_v38  ;;  %v2810_v31 = vsel %vm2592_vm7, %v2809_v14, %v2808_v16  ;;  %v3252_v58 = vld [vmem:[#allocation3 + $0x68] sm:$0xff] }
 0x3d6   :  { %v2778_v63 = vsel %vm2595_vm8, %v2777_v18, %v2776_v42  ;;  %v2679_v7 = vsel %vm2595_vm8, %v2569_v21, %v2678_v57  ;;  %v2812_v61 = vsel %vm2595_vm8, %v2811_v44, %v2810_v31  ;;  %v2712_v48 = vsel %vm2592_vm7, %v2711_v32, %v2710_v20 }
 0x3d7   :  { %v2780_v39 = vsel %vm2598_vm9, %v2779_v50, %v2778_v63  ;;  %v2681_v6 = vsel %vm2598_vm9, %v2680_v28, %v2679_v7  ;;  %v2814_v3 = vsel %vm2598_vm9, %v2813_v43, %v2812_v61  ;;  %v2713_v56 = vrot.slane %v2569_v21, 1 }
 0x3d8   :  { %v2842_v47 = vrot.slane %v2567_v62, 7  ;;  %v2843_v51 = vrot.slane %v2568_v2, 6  ;;  %v2845_v33 = vrot.slane %v2569_v21, 5  ;;  %v2847_v10 = vrot.slane %v2570_v45, 4 }
 0x3d9   :  { %v2714_v23 = vsel %vm2595_vm8, %v2713_v56, %v2712_v48  ;;  %v2744_v30 = vrot.slane %v2567_v62, 4  ;;  %v2745_v53 = vrot.slane %v2568_v2, 3  ;;  %v2747_v46 = vrot.slane %v2569_v21, 2 }
 0x3da   :  { %v4592_v49 = vsel %vm2598_vm9, %v2570_v45, %v2714_v23  ;;  %v2844_v19 = vsel %vm2592_vm7, %v2843_v51, %v2842_v47  ;;  %v2612_v15 = vrot.slane %v2568_v2, 7  ;;  %v2749_v17 = vrot.slane %v2570_v45, 1 }
 0x3db   :  { %v2846_v29 = vsel %vm2595_vm8, %v2845_v33, %v2844_v19  ;;  %v2746_v25 = vsel %vm2592_vm7, %v2745_v53, %v2744_v30  ;;  %v2614_v52 = vrot.slane %v2569_v21, 6  ;;  %v2616_v0 = vrot.slane %v2570_v45, 5 }
 0x3dc   :  { %v4598_v55 = vsel %vm2598_vm9, %v2847_v10, %v2846_v29  ;;  %v2748_v8 = vsel %vm2595_vm8, %v2747_v46, %v2746_v25  ;;  %v2613_v60 = vsel %vm2592_vm7, %v2612_v15, %v2567_v62 }
 0x3dd   :  { %v4603_v12 = vsel %vm2598_vm9, %v2749_v17, %v2748_v8  ;;  %v2615_v11 = vsel %vm2595_vm8, %v2614_v52, %v2613_v60 }
 0x3de   :  { %v4607_v54 = vsel %vm2598_vm9, %v2616_v0, %v2615_v11 }
 0x3e6   :  { %v3176_v41 = vpop.f32.mrb[16].mxu0 }
 0x3e7   :  { %v2537_v1 = vadd.f32 %v3176_v41, %v4415_v5  ;;  %v2528_v21 = vpop.f32.mrb[17].mxu0 }
 0x3e8   :  { %v2529_v24 = vadd.f32 %v4415_v5, %v2528_v21  ;;  %v3177_v37 = vpop.f32.mrb[18].mxu0 }
 0x3e9   :  { %v2557_v18 = vadd.f32 %v3249_v4, %v2537_v1  ;;  %v2540_v62 = vadd.f32 %v3177_v37, %v4415_v5  ;;  %v2531_v45 = vpop.f32.mrb[19].mxu0 }
 0x3ea   :  { %v2555_v44 = vadd.f32 %v3250_v9, %v2529_v24  ;;  %v2532_v2 = vadd.f32 %v4415_v5, %v2531_v45 }
 0x3eb   :  { %v4613_v26 = vmax.f32 %v2557_v18, 0.0  ;;  %v2558_v38 = vadd.f32 %v3251_v40, %v2540_v62 }
 0x3ec   :  { %v4615_v50 = vmax.f32 %v2555_v44, 0.0  ;;  %v2556_v28 = vadd.f32 %v3252_v58, %v2532_v2 }
 0x3ed   :  { %v4617_v16 = vmax.f32 %v2558_v38, 0.0  ;;  %v2784_v22 = vrot.slane %v4613_v26, 7  ;;  %v2652_v35 = vrot.slane %v4613_v26, 3  ;;  %v2686_v34 = vrot.slane %v4613_v26, 4 }
 0x3ee   :  { %v2572_v14 = vmax.f32 %v2556_v28, 0.0  ;;  %v2781_v13 = vrot.slane %v4615_v50, 1  ;;  %v2648_v5 = vrot.slane %v4615_v50, 5  ;;  %v2682_v43 = vrot.slane %v4615_v50, 6 }
 0x3ef   :  { %v2786_v20 = vrot.slane %v4617_v16, 6  ;;  %v2654_v32 = vrot.slane %v4617_v16, 2  ;;  %v2688_v42 = vrot.slane %v4617_v16, 3  ;;  %v2815_v57 = vrot.slane %v4615_v50, 2 }
 0x3f0   :  { %v2782_v31 = vsel %vm2601_vm11, %v2781_v13, %v2780_v39  ;;  %v2649_v63 = vsel %vm2601_vm11, %v2648_v5, %v4579_v59  ;;  %v2650_v7 = vrot.slane %v2572_v14, 4  ;;  %v2683_v61 = vsel %vm2601_vm11, %v2682_v43, %v2681_v6 }
 0x3f1   :  { %v2783_v48 = vsel %vm2604_vm10, %v2572_v14, %v2782_v31  ;;  %v2684_v56 = vrot.slane %v2572_v14, 5  ;;  %v2816_v47 = vsel %vm2601_vm11, %v2815_v57, %v2814_v3  ;;  %v2817_v51 = vrot.slane %v2572_v14, 1 }
 0x3f2   :  { %v2785_v33 = vsel %vm2607_vm12, %v2784_v22, %v2783_v48  ;;  %v2651_v23 = vsel %vm2604_vm10, %v2650_v7, %v2649_v63  ;;  %v2820_v10 = vrot.slane %v4617_v16, 7  ;;  %v2716_v39 = vrot.slane %v4615_v50, 7 }
 0x3f3   :  { %v2787_v30 = vsel %vm2610_vm13, %v2786_v20, %v2785_v33  ;;  %v2653_v59 = vsel %vm2607_vm12, %v2652_v35, %v2651_v23  ;;  %v2685_v6 = vsel %vm2604_vm10, %v2684_v56, %v2683_v61  ;;  %v2818_v53 = vsel %vm2604_vm10, %v2817_v51, %v2816_v47 }
 0x3f4   :  { %2790 = vrot.lane.b32.xlu1 %v2787_v30, %s3310_s23  ;;  %v2655_v3 = vsel %vm2610_vm13, %v2654_v32, %v2653_v59  ;;  %v2687_v19 = vsel %vm2607_vm12, %v2686_v34, %v2685_v6  ;;  %v2819_v46 = vsel %vm2607_vm12, %v4613_v26, %v2818_v53  ;;  %v2717_v15 = vsel %vm2601_vm11, %v2716_v39, %v4592_v49 }
 0x3f5   :  { %v2689_v29 = vsel %vm2610_vm13, %v2688_v42, %v2687_v19  ;;  %v2821_v25 = vsel %vm2610_vm13, %v2820_v10, %v2819_v46  ;;  %v2718_v17 = vrot.slane %v2572_v14, 6  ;;  %v2720_v52 = vrot.slane %v4613_v26, 5 }
 0x3f6   :  { %v2722_v8 = vrot.slane %v4617_v16, 4  ;;  %v2849_v60 = vrot.slane %v4615_v50, 3  ;;  %v2851_v0 = vrot.slane %v2572_v14, 2  ;;  %v2853_v41 = vrot.slane %v4613_v26, 1 }
 0x3f7   :  { %v2719_v11 = vsel %vm2604_vm10, %v2718_v17, %v2717_v15  ;;  %v2752_v1 = vrot.slane %v2572_v14, 7  ;;  %v2754_v21 = vrot.slane %v4613_v26, 6  ;;  %v2756_v37 = vrot.slane %v4617_v16, 5 }
 0x3f8   :  { %2658 = vrot.lane.b32.xlu1 %v2655_v3, %s3310_s23  ;;  %v2721_v49 = vsel %vm2607_vm12, %v2720_v52, %v2719_v11  ;;  %v2850_v24 = vsel %vm2601_vm11, %v2849_v60, %v4598_v55  ;;  %v2751_v4 = vsel %vm2601_vm11, %v4615_v50, %v4603_v12  ;;  %v2620_v9 = vrot.slane %v2572_v14, 3 }
 0x3f9   :  { %v2723_v18 = vsel %vm2610_vm13, %v2722_v8, %v2721_v49  ;;  %v2852_v62 = vsel %vm2604_vm10, %v2851_v0, %v2850_v24  ;;  %v2753_v45 = vsel %vm2604_vm10, %v2752_v1, %v2751_v4  ;;  %v2618_v40 = vrot.slane %v4615_v50, 4 }
 0x3fa   :  { %v2854_v44 = vsel %vm2607_vm12, %v2853_v41, %v2852_v62  ;;  %v2755_v2 = vsel %vm2607_vm12, %v2754_v21, %v2753_v45  ;;  %v2622_v12 = vrot.slane %v4613_v26, 2  ;;  %v2624_v28 = vrot.slane %v4617_v16, 1 }
 0x3fb   :  { %v2855_v55 = vsel %vm2610_vm13, %v4617_v16, %v2854_v44  ;;  %v2757_v38 = vsel %vm2610_vm13, %v2756_v37, %v2755_v2  ;;  %v2619_v58 = vsel %vm2601_vm11, %v2618_v40, %v4607_v54 }
 0x3fc   :  { %2692 = vrot.lane.b32.xlu1 %v2689_v29, %s3308_s21  ;;  %v2621_v22 = vsel %vm2604_vm10, %v2620_v9, %v2619_v58 }
 0x3fd   :  { %v2623_v35 = vsel %vm2607_vm12, %v2622_v12, %v2621_v22 }
 0x3fe   :  { %v2625_v50 = vsel %vm2610_vm13, %v2624_v28, %v2623_v35 }
 0x400   :  { %2824 = vrot.lane.b32.xlu1 %v2821_v25, %s3308_s21 }
 0x404   :  { %2726 = vrot.lane.b32.xlu1 %v2723_v18, %s3312_s6 }
 0x408   :  { %2858 = vrot.lane.b32.xlu1 %v2855_v55, %s3312_s6 }
 0x424   :  { %v2789_v34 = vpop.permute.xlu0 %2788 }
 0x425   :  { %v2869_v20 = vsel %vm89_vm0, %v4561_v36, %v2789_v34 }
 0x428   :  { %v2657_v14 = vpop.permute.xlu0 %2656 }
 0x429   :  { %v2862_v54 = vsel %vm89_vm0, %v4568_v27, %v2657_v14 }
 0x42c   :  { %v2691_v26 = vpop.permute.xlu0 %2690 }
 0x42d   :  { %v2864_v16 = vsel %vm2209_vm5, %v2862_v54, %v2691_v26 }
 0x430   :  { %v2823_v13 = vpop.permute.xlu0 %2822 }
 0x431   :  { %v2871_v32 = vsel %vm2209_vm5, %v2869_v20, %v2823_v13 }
 0x434   :  { %v2725_v5 = vpop.permute.xlu0 %2724 }
 0x435   :  { %v2867_v43 = vsel %vm2866_vm14, %v2864_v16, %v2725_v5 }
 0x436   :  { %2875 = vst [vmem:[#allocation6] sm:$0xff] %v2867_v43 }
 0x438   :  { %v2857_v42 = vpop.permute.xlu0 %2856 }
 0x439   :  { %v2873_v57 = vsel %vm2866_vm14, %v2871_v32, %v2857_v42 }
 0x43a   :  { %2876 = vst [vmem:[#allocation6 + $0x8] sm:$0xff] %v2873_v57 }
 0x466   :  { %v2791_v31 = vpop.permute.xlu1 %2790 }
 0x467   :  { %v2870_v36 = vsel %vm89_vm0, %v2757_v38, %v2791_v31 }
 0x46a   :  { %v2659_v63 = vpop.permute.xlu1 %2658 }
 0x46b   :  { %v2863_v27 = vsel %vm89_vm0, %v2625_v50, %v2659_v63 }
 0x46e   :  { %v2693_v7 = vpop.permute.xlu1 %2692 }
 0x46f   :  { %v2865_v48 = vsel %vm2209_vm5, %v2863_v27, %v2693_v7 }
 0x472   :  { %v2825_v61 = vpop.permute.xlu1 %2824 }
 0x473   :  { %v2872_v51 = vsel %vm2209_vm5, %v2870_v36, %v2825_v61 }
 0x476   :  { %v2727_v56 = vpop.permute.xlu1 %2726 }
 0x477   :  { %v2868_v47 = vsel %vm2866_vm14, %v2865_v48, %v2727_v56 }
 0x478   :  { %2877 = vst [vmem:[#allocation6 + $0x10] sm:$0xff] %v2868_v47 }
 0x47a   :  { %v2859_v33 = vpop.permute.xlu1 %2858 }
 0x47b   :  { %v2874_v23 = vsel %vm2866_vm14, %v2872_v51, %v2859_v33 }
 0x47c   :  { %2878 = vst [vmem:[#allocation6 + $0x18] sm:$0xff] %v2874_v23 }
 0x47d   :  { %3286 = shalt.err (!%p3283_p12)
}
 0x47e   :  { %s3287_s1 = scalar_lea.hbm %s4720_s7, 512 }
 0x47f   :  { %p3288_p13 = scmp.ne.s32.totalorder %s4720_s7, %s3287_s1  ;;  %p3291_p0 = scmp.lt.u32.totalorder %s3287_s1, %s4720_s7 }
 0x481   :  { %p3293_p1 = pnand %p3291_p0, %p3288_p13 }
 0x483   :  { %3296 = shalt.err (!%p3293_p1)
}
 0x484   :  { %s3314_s23 = smov 256  }
 0x485   :  { %2890 = dma.vmem_to_hbm [thread:$0]  %s2885_s16, 512, %s4720_s7, [#allocation5], %s3314_s23, %s3314_s23, %s3307_s20  }
 0x486   :  { %3299 = dma.done.wait [#allocation5], 512  }
 0x487   :  { %3300 = vsyncadd [#allocation5], 4294966784 }
 0x488   :  { %2894 = vsyncpa [#allocation4], 1 }
 0x489   :  { %2895 = vsyncpa [#allocation5], 1 }

</bundles_post_ra>
